<compile_context>
chip_gen: v7x
topology: tpu7x:2x2x1
jax: 0.10.0
libtpu: 0.0.40
codegen_flags: <defaults>
</compile_context>

<pallas_src>
import jax
import jax.numpy as jnp
from jax.experimental import pallas as pl
from jax.experimental.pallas import tpu as pltpu

H1, H2 = 512, 256
_NEG_SLOPE = 0.2
# Conservative per-call VMEM budget used when choosing tile_b (fits v7x 64 MiB
# with room for compiler scratch; trivially fits v5e/v6e 128 MiB).
_TILE_VMEM_BUDGET = 32 << 20


def discriminator_kernel(x_ref, w1_ref, b1_ref, w2_ref, b2_ref, w3_ref, b3_ref, o_ref):
    # x_ref:(tile_b, D) f32 | w1:(D,512) bf16 | w2:(512,256) bf16  -> MXU
    # b1:(1,512) f32 | b2:(1,256) f32 | w3:(1,256) f32 | b3:(1,) f32 SMEM
    # o_ref:(1, tile_b) f32 lane-dense (batch on the lane axis).

    # In-kernel bf16 cast: VPU work hidden under MXU slack, saves a wrapper-side
    # HBM read+write pass over x.
    x = x_ref[...].astype(jnp.bfloat16)

    # Layer 1: bf16 MXU matmul, f32 accumulation; LeakyReLU(0.2) in f32 on VPU.
    h1 = jnp.dot(x, w1_ref[...], preferred_element_type=jnp.float32) + b1_ref[...]
    h1 = jnp.where(h1 > 0, h1, _NEG_SLOPE * h1)

    # Layer 2: same pattern (only the matmul operand is cast to bf16).
    h2 = jnp.dot(h1.astype(jnp.bfloat16), w2_ref[...],
                 preferred_element_type=jnp.float32) + b2_ref[...]
    h2 = jnp.where(h2 > 0, h2, _NEG_SLOPE * h2)

    # Layer 3 (out_features = 1): VPU multiply + lane reduction instead of an
    # MXU pass with a single useful output column.  The (tile_b,) -> (1, tile_b)
    # relayout below only moves tile_b scalars per grid step; restructuring to a
    # fully transposed dataflow would need a (tile_b, D) in-kernel transpose or
    # an extra wrapper HBM pass, which costs more, so it is kept.
    logit = jnp.sum(h2 * w3_ref[...], axis=-1) + b3_ref[0]            # (tile_b,)

    # Sigmoid: exp and approx reciprocal both ride the otherwise-idle EUP slot.
    sig = pl.reciprocal(1.0 + jnp.exp(-logit), approx=True)
    o_ref[...] = sig[None, :]                                          # lane-dense store


def _round_up(x, m):
    return ((x + m - 1) // m) * m


def _choose_tile_b(B, D, x_itemsize, budget_bytes):
    """Pick a batch tile (multiple of 128).

    Prefers the largest candidate whose per-step VMEM footprint fits the budget
    (good MXU row fill on the 256-wide v6e/v7x MXU, amortized per-step
    overhead), never exceeds the 128-padded batch, and splits into >=2 grid
    steps (DMA pipelining / both v7x TensorCores) only when each step still
    gets >= 256 rows.
    """
    # Per-row VMEM bytes: double-buffered x tile + in-kernel bf16 copy of x +
    # f32/bf16 h1 + f32/bf16 h2 + misc.
    per_row = 2 * D * x_itemsize + 2 * D + H1 * (4 + 2) + H2 * (4 + 2) + 64
    fixed = D * H1 * 2 + H1 * H2 * 2 + (1 << 20)   # single-buffered bf16 weights + slack
    tile_b = 128
    for cand in (4096, 2048, 1024, 512, 256, 128):
        if fixed + cand * per_row <= budget_bytes:
            tile_b = cand
            break
    b128 = _round_up(B, 128)
    tile_b = min(tile_b, b128)
    if tile_b >= b128 and b128 >= 512:
        # Whole batch would be one step: split in two so the x DMA pipelines and
        # both v7x TensorCores get work, as long as each step keeps >=256 rows.
        tile_b = _round_up(b128 // 2, 128)
    return tile_b


def _vmem_limit_bytes(tile_b, D, x_itemsize):
    """Size the Mosaic VMEM limit from the actual footprint (review: don't ask
    for the whole 64 MiB on v7x)."""
    weights = D * H1 * 2 + H1 * H2 * 2 + 3 * 8 * H1 * 4     # bf16 mats + padded small vecs
    x_bufs = 2 * tile_b * D * x_itemsize                    # double-buffered x tile
    out_bufs = 2 * 8 * tile_b * 4                           # (1,tile_b) padded to 8 sublanes, x2
    temps = tile_b * (2 * D + H1 * (4 + 2) + H2 * (4 + 2) + 64)
    total = weights + x_bufs + out_bufs + temps + (8 << 20)  # + compiler scratch headroom
    total = max(total, 24 << 20)
    return min(total, 48 << 20)


def discriminator_forward(x, params, *, tile_b=None):
    """x: (B, input_size).  params: dict with w1/b1/w2/b2/w3/b3 (torch shapes,
    weights already transposed to (in, out))."""
    B, D = x.shape
    x_itemsize = jnp.dtype(x.dtype).itemsize
    if tile_b is None:
        tile_b = _choose_tile_b(B, D, x_itemsize, _TILE_VMEM_BUDGET)
    assert tile_b % 128 == 0, "tile_b must be a multiple of 128 (lane-dense output)"

    # Pad the batch so every block is full; slice the result back at the end.
    B_pad = _round_up(B, tile_b)
    if B_pad != B:
        x = jnp.pad(x, ((0, B_pad - B), (0, 0)))

    # MXU weight operands in bf16 (x is cast inside the kernel); biases and the
    # final-layer vector stay f32 (safe on v5e's f32-only VPU).
    w1 = params["w1"].astype(jnp.bfloat16)                  # (D, 512)
    w2 = params["w2"].astype(jnp.bfloat16)                  # (512, 256)
    b1 = params["b1"].reshape(1, H1).astype(jnp.float32)    # (1, 512)
    b2 = params["b2"].reshape(1, H2).astype(jnp.float32)    # (1, 256)
    w3 = params["w3"].reshape(1, H2).astype(jnp.float32)    # (1, 256)
    b3 = params["b3"].reshape(1).astype(jnp.float32)        # (1,)

    single = pl.Buffered(1)   # grid-invariant operands: no double-buffering
    grid = (B_pad // tile_b,)
    out_row = pl.pallas_call(
        discriminator_kernel,
        out_shape=jax.ShapeDtypeStruct((1, B_pad), jnp.float32),
        grid_spec=pltpu.PrefetchScalarGridSpec(
            num_scalar_prefetch=0,
            grid=grid,
            in_specs=[
                pl.BlockSpec((tile_b, D), lambda i: (i, 0)),                 # x tile
                pl.BlockSpec((D, H1), lambda i: (0, 0), pipeline_mode=single),   # w1
                pl.BlockSpec((1, H1), lambda i: (0, 0), pipeline_mode=single),   # b1
                pl.BlockSpec((H1, H2), lambda i: (0, 0), pipeline_mode=single),  # w2
                pl.BlockSpec((1, H2), lambda i: (0, 0), pipeline_mode=single),   # b2
                pl.BlockSpec((1, H2), lambda i: (0, 0), pipeline_mode=single),   # w3
                pl.BlockSpec(memory_space=pltpu.MemorySpace.SMEM),               # b3 scalar
            ],
            out_specs=pl.BlockSpec((1, tile_b), lambda i: (0, i)),           # lane-dense
        ),
        compiler_params=pltpu.CompilerParams(
            dimension_semantics=("parallel",),
            vmem_limit_bytes=_vmem_limit_bytes(tile_b, D, x_itemsize),
        ),
    )(x, w1, b1, w2, b2, w3, b3)
    return out_row[0, :B].reshape(B, 1)


def init_params(key, input_size):
    """Mirror nn.Linear init; weights stored transposed so y = x @ W + b."""
    k1, k2, k3, k4, k5, k6 = jax.random.split(key, 6)
    s1 = 1.0 / jnp.sqrt(input_size)
    s2 = 1.0 / jnp.sqrt(512.0)
    s3 = 1.0 / jnp.sqrt(256.0)
    return {
        "w1": jax.random.uniform(k1, (input_size, 512), jnp.float32, -s1, s1),
        "b1": jax.random.uniform(k2, (1, 512), jnp.float32, -s1, s1),
        "w2": jax.random.uniform(k3, (512, 256), jnp.float32, -s2, s2),
        "b2": jax.random.uniform(k4, (1, 256), jnp.float32, -s2, s2),
        "w3": jax.random.uniform(k5, (256, 1), jnp.float32, -s3, s3),
        "b3": jax.random.uniform(k6, (1, 1), jnp.float32, -s3, s3),
    }


def reference_forward(x, p):
    # Same math as the kernel (bf16-rounded matmul operands, f32 accumulation).
    xb = x.astype(jnp.bfloat16).astype(jnp.float32)
    w1 = p["w1"].astype(jnp.bfloat16).astype(jnp.float32)
    w2 = p["w2"].astype(jnp.bfloat16).astype(jnp.float32)
    h1 = xb @ w1 + p["b1"]
    h1 = jnp.where(h1 > 0, h1, _NEG_SLOPE * h1)
    h2 = h1.astype(jnp.bfloat16).astype(jnp.float32) @ w2 + p["b2"]
    h2 = jnp.where(h2 > 0, h2, _NEG_SLOPE * h2)
    return jax.nn.sigmoid(h2 @ p["w3"] + p["b3"])


if __name__ == "__main__":
    key = jax.random.PRNGKey(0)
    kx, kp, kx2 = jax.random.split(key, 3)

    input_size = 32
    params = init_params(kp, input_size)

    # Small smoke test: B=8 pads to one 128-row tile.
    x_small = jax.random.normal(kx, (8, input_size), jnp.float32)
    out_small = jax.block_until_ready(discriminator_forward(x_small, params))
    ref_small = reference_forward(x_small, params)
    assert out_small.shape == (8, 1)
    assert jnp.allclose(out_small, ref_small, atol=2e-2, rtol=2e-2), float(
        jnp.max(jnp.abs(out_small - ref_small)))

    # Padded multi-step path: B=600 -> padded batch, 2 grid steps, sliced back.
    x_big = jax.random.normal(kx2, (600, input_size), jnp.float32)
    out_big = jax.block_until_ready(discriminator_forward(x_big, params))
    ref_big = reference_forward(x_big, params)
    assert out_big.shape == (600, 1)
    assert jnp.allclose(out_big, ref_big, atol=2e-2, rtol=2e-2), float(
        jnp.max(jnp.abs(out_big - ref_big)))

    print("KERNEL_OK")
</pallas_src>

<mosaic_0001>
module attributes {stable_mosaic.version = 11 : i64} {
  func.func @discriminator_kernel(%arg0: i32, %arg1: memref<128x32xf32, #tpu.memory_space<vmem>>, %arg2: memref<32x512xbf16, #tpu.memory_space<vmem>>, %arg3: memref<1x512xf32, #tpu.memory_space<vmem>>, %arg4: memref<512x256xbf16, #tpu.memory_space<vmem>>, %arg5: memref<1x256xf32, #tpu.memory_space<vmem>>, %arg6: memref<1x256xf32, #tpu.memory_space<vmem>>, %arg7: memref<1xf32, #tpu.memory_space<smem>>, %arg8: memref<1x128xf32, #tpu.memory_space<vmem>>) attributes {dimension_semantics = [#tpu.dimension_semantics<parallel>], iteration_bounds = array<i64: 1>, scalar_prefetch = 0 : i64, scratch_operands = 0 : i64, tpu.core_type = #tpu.core_type<tc>, window_params = [{transform_indices = @transform_0, window_bounds = array<i64: 128, 32>}, {pipeline_mode = #tpu.pipeline_mode<synchronous>, transform_indices = @transform_1, window_bounds = array<i64: 32, 512>}, {pipeline_mode = #tpu.pipeline_mode<synchronous>, transform_indices = @transform_2, window_bounds = array<i64: 1, 512>}, {pipeline_mode = #tpu.pipeline_mode<synchronous>, transform_indices = @transform_3, window_bounds = array<i64: 512, 256>}, {pipeline_mode = #tpu.pipeline_mode<synchronous>, transform_indices = @transform_4, window_bounds = array<i64: 1, 256>}, {pipeline_mode = #tpu.pipeline_mode<synchronous>, transform_indices = @transform_5, window_bounds = array<i64: 1, 256>}, {transform_indices = @transform_6, window_bounds = array<i64: 1>}, {transform_indices = @transform_7, window_bounds = array<i64: 1, 128>}]} {
    %c0 = arith.constant 0 : index
    %c0_0 = arith.constant 0 : index
    %0 = vector.load %arg1[%c0, %c0_0] : memref<128x32xf32, #tpu.memory_space<vmem>>, vector<128x32xf32>
    %1 = arith.truncf %0 : vector<128x32xf32> to vector<128x32xbf16>
    %c0_1 = arith.constant 0 : index
    %c0_2 = arith.constant 0 : index
    %2 = vector.load %arg2[%c0_1, %c0_2] : memref<32x512xbf16, #tpu.memory_space<vmem>>, vector<32x512xbf16>
    %cst = arith.constant dense<0.000000e+00> : vector<128x512xf32>
    %3 = tpu.matmul %1, %2, %cst {dimension_numbers = #tpu.dot_dimension_numbers<[1], [0], [0], [1], [0, 0, 1, 1], [], []>} : vector<128x32xbf16>, vector<32x512xbf16>, vector<128x512xf32> -> vector<128x512xf32>
    %c0_3 = arith.constant 0 : index
    %c0_4 = arith.constant 0 : index
    %4 = vector.load %arg3[%c0_3, %c0_4] : memref<1x512xf32, #tpu.memory_space<vmem>>, vector<1x512xf32>
    %5 = vector.broadcast %4 : vector<1x512xf32> to vector<128x512xf32>
    %6 = arith.addf %3, %5 : vector<128x512xf32>
    %cst_5 = arith.constant 0.000000e+00 : f32
    %7 = vector.broadcast %cst_5 : f32 to vector<128x512xf32>
    %8 = arith.cmpf ogt, %6, %7 : vector<128x512xf32>
    %cst_6 = arith.constant 2.000000e-01 : f32
    %9 = vector.broadcast %cst_6 : f32 to vector<128x512xf32>
    %10 = arith.mulf %9, %6 : vector<128x512xf32>
    %11 = arith.select %8, %6, %10 : vector<128x512xi1>, vector<128x512xf32>
    %12 = arith.truncf %11 : vector<128x512xf32> to vector<128x512xbf16>
    %c0_7 = arith.constant 0 : index
    %c0_8 = arith.constant 0 : index
    %13 = vector.load %arg4[%c0_7, %c0_8] : memref<512x256xbf16, #tpu.memory_space<vmem>>, vector<512x256xbf16>
    %cst_9 = arith.constant dense<0.000000e+00> : vector<128x256xf32>
    %14 = tpu.matmul %12, %13, %cst_9 {dimension_numbers = #tpu.dot_dimension_numbers<[1], [0], [0], [1], [0, 0, 1, 1], [], []>} : vector<128x512xbf16>, vector<512x256xbf16>, vector<128x256xf32> -> vector<128x256xf32>
    %c0_10 = arith.constant 0 : index
    %c0_11 = arith.constant 0 : index
    %15 = vector.load %arg5[%c0_10, %c0_11] : memref<1x256xf32, #tpu.memory_space<vmem>>, vector<1x256xf32>
    %16 = vector.broadcast %15 : vector<1x256xf32> to vector<128x256xf32>
    %17 = arith.addf %14, %16 : vector<128x256xf32>
    %cst_12 = arith.constant 0.000000e+00 : f32
    %18 = vector.broadcast %cst_12 : f32 to vector<128x256xf32>
    %19 = arith.cmpf ogt, %17, %18 : vector<128x256xf32>
    %cst_13 = arith.constant 2.000000e-01 : f32
    %20 = vector.broadcast %cst_13 : f32 to vector<128x256xf32>
    %21 = arith.mulf %20, %17 : vector<128x256xf32>
    %22 = arith.select %19, %17, %21 : vector<128x256xi1>, vector<128x256xf32>
    %c0_14 = arith.constant 0 : index
    %c0_15 = arith.constant 0 : index
    %23 = vector.load %arg6[%c0_14, %c0_15] : memref<1x256xf32, #tpu.memory_space<vmem>>, vector<1x256xf32>
    %24 = vector.broadcast %23 : vector<1x256xf32> to vector<128x256xf32>
    %25 = arith.mulf %22, %24 : vector<128x256xf32>
    %cst_16 = arith.constant dense<0.000000e+00> : vector<128xf32>
    %26 = vector.multi_reduction <add>, %25, %cst_16 [1] : vector<128x256xf32> to vector<128xf32>
    %c0_17 = arith.constant 0 : index
    %27 = memref.load %arg7[%c0_17] : memref<1xf32, #tpu.memory_space<smem>>
    %28 = vector.broadcast %27 : f32 to vector<128xf32>
    %29 = arith.addf %26, %28 : vector<128xf32>
    %cst_18 = arith.constant 0.000000e+00 : f32
    %30 = vector.broadcast %cst_18 : f32 to vector<128xf32>
    %31 = arith.subf %30, %29 : vector<128xf32>
    %32 = math.exp %31 : vector<128xf32>
    %cst_19 = arith.constant 1.000000e+00 : f32
    %33 = vector.broadcast %cst_19 : f32 to vector<128xf32>
    %34 = arith.addf %33, %32 : vector<128xf32>
    %35 = tpu.reciprocal %34 {approx = true} : vector<128xf32> -> vector<128xf32>
    %36 = vector.shape_cast %35 : vector<128xf32> to vector<1x128xf32>
    %c0_20 = arith.constant 0 : index
    %c0_21 = arith.constant 0 : index
    %37 = vector.load %arg8[%c0_20, %c0_21] : memref<1x128xf32, #tpu.memory_space<vmem>>, vector<1x128xf32>
    tpu.vector_store %arg8[%c0_20, %c0_21], %36 {strides = array<i32>} : memref<1x128xf32, #tpu.memory_space<vmem>>, vector<1x128xf32>,
    return
  }
  func.func @transform_0(%arg0: i32) -> (i32, i32) {
    %c0_i32 = arith.constant 0 : i32
    %c0_i32_0 = arith.constant 0 : i32
    return %arg0, %c0_i32 : i32, i32
  }
  func.func @transform_1(%arg0: i32) -> (i32, i32) {
    %c0_i32 = arith.constant 0 : i32
    %c0_i32_0 = arith.constant 0 : i32
    %c0_i32_1 = arith.constant 0 : i32
    return %c0_i32, %c0_i32_0 : i32, i32
  }
  func.func @transform_2(%arg0: i32) -> (i32, i32) {
    %c0_i32 = arith.constant 0 : i32
    %c0_i32_0 = arith.constant 0 : i32
    %c0_i32_1 = arith.constant 0 : i32
    return %c0_i32, %c0_i32_0 : i32, i32
  }
  func.func @transform_3(%arg0: i32) -> (i32, i32) {
    %c0_i32 = arith.constant 0 : i32
    %c0_i32_0 = arith.constant 0 : i32
    %c0_i32_1 = arith.constant 0 : i32
    return %c0_i32, %c0_i32_0 : i32, i32
  }
  func.func @transform_4(%arg0: i32) -> (i32, i32) {
    %c0_i32 = arith.constant 0 : i32
    %c0_i32_0 = arith.constant 0 : i32
    %c0_i32_1 = arith.constant 0 : i32
    return %c0_i32, %c0_i32_0 : i32, i32
  }
  func.func @transform_5(%arg0: i32) -> (i32, i32) {
    %c0_i32 = arith.constant 0 : i32
    %c0_i32_0 = arith.constant 0 : i32
    %c0_i32_1 = arith.constant 0 : i32
    return %c0_i32, %c0_i32_0 : i32, i32
  }
  func.func @transform_6(%arg0: i32) -> i32 {
    %c0_i32 = arith.constant 0 : i32
    %c0_i32_0 = arith.constant 0 : i32
    return %c0_i32 : i32
  }
  func.func @transform_7(%arg0: i32) -> (i32, i32) {
    %c0_i32 = arith.constant 0 : i32
    %c0_i32_0 = arith.constant 0 : i32
    return %c0_i32, %arg0 : i32, i32
  }
}

</mosaic_0001>

<bundles_post_ra>
// kernel: tpu_custom_call.1
= control target key start
LH: loop header
LB: loop body
LE: loop exit
PB: predicated region body
PF: predicated region fallthrough
CT: control target
= control target key end

     0   :  { %13 = vsyncpa [#allocation4], 0  ;;  %s2664_s0 = inlined_call_operand.vmem [shape: f32[128,32], index: 0, kind: input, shape index: {}]   ;;  %s2665_s1 = inlined_call_operand.vmem [shape: bf16[32,512], index: 1, kind: input, shape index: {}]   ;;  %s2666_s2 = inlined_call_operand.vmem [shape: f32[1,512], index: 2, kind: input, shape index: {}]   ;;  %s2667_s3 = inlined_call_operand.hbm [shape: bf16[512,256], index: 3, kind: input, shape index: {}]   ;;  %s2668_s4 = inlined_call_operand.vmem [shape: f32[1,256], index: 4, kind: input, shape index: {}]   ;;  %s2669_s5 = inlined_call_operand.vmem [shape: f32[1,256], index: 5, kind: input, shape index: {}]   ;;  %s2670_s6 = inlined_call_operand.<no memory space> [shape: f32[1], index: 6, kind: input, shape index: {}]   ;;  %s2671_s7 = inlined_call_operand.hbm [shape: f32[1,128], index: 7, kind: output, shape index: {}]  }
   0x1   :  { %14 = vsyncpa [#allocation5], 0  ;;  %s2041_s24 = smov [#allocation3]   ;;  %s1993_s28 = scalar_lea.hbm %s2667_s3, 8192 }
   0x2   :  { %s26_s25 = sshll.u32 %s2041_s24, 4  ;;  %p1994_p0 = scmp.ne.s32.totalorder %s2667_s3, %s1993_s28  ;;  %s27_s25 = int_to_ptr.vmem [resolvable:$true] %s26_s25 }
   0x3   :  { %p1997_p1 = scmp.lt.u32.totalorder %s1993_s28, %s2667_s3 }
   0x5   :  { %p1999_p2 = pnand %p1997_p1, %p1994_p0 }
   0x7   :  { %2002 = shalt.err (!%p1999_p2)
}
   0x8   :  { %s2003_s10 = scalar_lea.vmem %s27_s25, 8192  ;;  %p2008_p4 = scmp.lt.s32.totalorder %s27_s25, %s27_s25 }
   0x9   :  { %p2004_p3 = scmp.ne.s32.totalorder %s27_s25, %s2003_s10  ;;  %p2009_p5 = scmp.lt.s32.totalorder %s2003_s10, %s2003_s10 }
   0xb   :  { %p2010_p6 = por %p2009_p5, %p2008_p4 }
   0xd   :  { %p2011_p7 = pnand %p2010_p6, %p2004_p3 }
   0xf   :  { %2014 = shalt.err (!%p2011_p7)
}
  0x10   :  { %s2042_s11 = smov 128   ;;  %s2043_s12 = smov 8  }
  0x11   :  { %32 = dma.hbm_to_vmem [thread:$0]  %s2667_s3, 8192, %s27_s25, [#allocation4], %s2042_s11, %s2042_s11, %s2043_s12  }
  0x12   :  { %2037 = dma.done.wait [#allocation4], 8192  }
  0x13   :  { %2038 = vsyncadd [#allocation4], 4294959104  ;;  %v2044_v0 = vmov 0   ;;  %v1821_v1 = vld [vmem:[%s2665_s1 + $0x4] ss:$16 sps:$4 sm:$0xff]   ;;  %v44_v10 = vld [vmem:[%s2664_s0 + $0x8] sm:$0xff] }
  0x14   :  { %194 = vmatprep.mubr.bf16.mxu0 %v2044_v0  ;;  %307 = vmatprep.mubr.bf16.mxu1 %v2044_v0  ;;  %v1823_v2 = vld [vmem:[%s2665_s1 + $0xc] ss:$16 sps:$4 sm:$0xff]   ;;  %v1825_v3 = vld [vmem:[%s2665_s1] ss:$16 sps:$4 sm:$0xff]   ;;  %v1826_v4 = vld [vmem:[%s2665_s1 + $0x8] ss:$16 sps:$4 sm:$0xff]  }
  0x15   :  { %162 = vmatprep.subr.bf16.mxu0 %v1821_v1  ;;  %275 = vmatprep.subr.bf16.mxu1 %v1823_v2  ;;  %v1827_v5 = vld [vmem:[%s2665_s1 + $0x24] ss:$16 sps:$4 sm:$0xff]   ;;  %v1829_v6 = vld [vmem:[%s2665_s1 + $0x2c] ss:$16 sps:$4 sm:$0xff]   ;;  %v1831_v7 = vld [vmem:[%s2665_s1 + $0x20] ss:$16 sps:$4 sm:$0xff]  }
  0x16   :  { %163 = vmatpush1.bf16.msra.mxu0 %v1825_v3  ;;  %276 = vmatpush1.bf16.msra.mxu1 %v1826_v4  ;;  %v1832_v8 = vld [vmem:[%s2665_s1 + $0x28] ss:$16 sps:$4 sm:$0xff]   ;;  %v43_v9 = vld [vmem:[%s2664_s0] sm:$0xff]  ;;  %vm137_vm0 = vcmask 261120   ;;  %v45_v12 = vld [vmem:[%s2664_s0 + $0x10] sm:$0xff] }
  0x17   :  { %164 = vmatprep.subr.bf16.mxu0 %v1827_v5  ;;  %277 = vmatprep.subr.bf16.mxu1 %v1829_v6  ;;  %v59_v11 = vpack.c.bf16 %v44_v10, %v43_v9  ;;  %v46_v13 = vld [vmem:[%s2664_s0 + $0x18] sm:$0xff]  ;;  %v1833_v14 = vld [vmem:[#allocation3] ss:$8 sps:$4 sm:$0xff]   ;;  %v1835_v15 = vld [vmem:[#allocation3 + $0x4] ss:$8 sps:$4 sm:$0xff]  }
  0x18   :  { %v1836_v16 = vld [vmem:[#allocation3 + $0x100] ss:$8 sps:$4 sm:$0xff]   ;;  %v1838_v17 = vld [vmem:[#allocation3 + $0x104] ss:$8 sps:$4 sm:$0xff]   ;;  %v1839_v18 = vld [vmem:[#allocation3 + $0x10] ss:$8 sps:$4 sm:$0xff]   ;;  %v60_v20 = vpack.c.bf16 %v46_v13, %v45_v12 }
  0x19   :  { %v1841_v19 = vld [vmem:[#allocation3 + $0x14] ss:$8 sps:$4 sm:$0xff]   ;;  %v1842_v22 = vld [vmem:[#allocation3 + $0x110] ss:$8 sps:$4 sm:$0xff]   ;;  %v1847_v23 = vld [vmem:[#allocation3 + $0x24] ss:$8 sps:$4 sm:$0xff]  }
  0x1a   :  { %165 = vmatpush1.bf16.msra.mxu0 %v1831_v7  ;;  %278 = vmatpush1.bf16.msra.mxu1 %v1832_v8  ;;  %v1844_v21 = vld [vmem:[#allocation3 + $0x114] ss:$8 sps:$4 sm:$0xff]   ;;  %v1845_v24 = vld [vmem:[#allocation3 + $0x20] ss:$8 sps:$4 sm:$0xff]   ;;  %v1850_v25 = vld [vmem:[#allocation3 + $0x124] ss:$8 sps:$4 sm:$0xff]  }
  0x1b   :  { %1008 = vmatprep.subr.bf16.mxu1 %v1835_v15  ;;  %1121 = vmatprep.subr.bf16.mxu0 %v1838_v17  ;;  %v47_v26 = vld [vmem:[%s2664_s0 + $0x20] sm:$0xff]  ;;  %v1853_v27 = vld [vmem:[#allocation3 + $0x34] ss:$8 sps:$4 sm:$0xff]   ;;  %v48_v28 = vld [vmem:[%s2664_s0 + $0x28] sm:$0xff] }
  0x1c   :  { %v1848_v29 = vld [vmem:[#allocation3 + $0x120] ss:$8 sps:$4 sm:$0xff]   ;;  %v1851_v30 = vld [vmem:[#allocation3 + $0x30] ss:$8 sps:$4 sm:$0xff]   ;;  %v1856_v31 = vld [vmem:[#allocation3 + $0x134] ss:$8 sps:$4 sm:$0xff]   ;;  %v61_v32 = vpack.c.bf16 %v48_v28, %v47_v26 }
  0x1d   :  { %1672 = vmatmul.mubr.msk.bf16.vlgmr.msra.gmra.mrb[0].mxu0 %vm137_vm0, %v59_v11  ;;  %1680 = vmatmul.mubr.msk.bf16.vlgmr.msra.gmra.mrb[0].mxu1 %vm137_vm0, %v59_v11  ;;  %v1854_v33 = vld [vmem:[#allocation3 + $0x130] ss:$8 sps:$4 sm:$0xff]   ;;  %v1859_v34 = vld [vmem:[#allocation3 + $0x44] ss:$8 sps:$4 sm:$0xff]   ;;  %v1857_v35 = vld [vmem:[#allocation3 + $0x40] ss:$8 sps:$4 sm:$0xff]  }
  0x1e   :  { %204 = vmatprep.mubr.bf16.mxu0 %v2044_v0  ;;  %317 = vmatprep.mubr.bf16.mxu1 %v2044_v0  ;;  %v1862_v36 = vld [vmem:[#allocation3 + $0x144] ss:$8 sps:$4 sm:$0xff]   ;;  %v49_v37 = vld [vmem:[%s2664_s0 + $0x30] sm:$0xff]  ;;  %v50_v39 = vld [vmem:[%s2664_s0 + $0x38] sm:$0xff] }
  0x1f   :  { %1009 = vmatpush1.bf16.msra.mxu1 %v1833_v14  ;;  %1122 = vmatpush1.bf16.msra.mxu0 %v1836_v16  ;;  %v1865_v38 = vld [vmem:[#allocation3 + $0x54] ss:$8 sps:$4 sm:$0xff]   ;;  %v1860_v40 = vld [vmem:[#allocation3 + $0x140] ss:$8 sps:$4 sm:$0xff]   ;;  %v1863_v41 = vld [vmem:[#allocation3 + $0x50] ss:$8 sps:$4 sm:$0xff]   ;;  %v62_v43 = vpack.c.bf16 %v50_v39, %v49_v37 }
  0x20   :  { %1010 = vmatprep.subr.bf16.mxu1 %v1841_v19  ;;  %1123 = vmatprep.subr.bf16.mxu0 %v1844_v21  ;;  %v1868_v42 = vld [vmem:[#allocation3 + $0x154] ss:$8 sps:$4 sm:$0xff]   ;;  %v1866_v44 = vld [vmem:[#allocation3 + $0x150] ss:$8 sps:$4 sm:$0xff]   ;;  %v1871_v45 = vld [vmem:[#allocation3 + $0x64] ss:$8 sps:$4 sm:$0xff]  }
  0x21   :  { %v1869_v46 = vld [vmem:[#allocation3 + $0x60] ss:$8 sps:$4 sm:$0xff]   ;;  %v1874_v47 = vld [vmem:[#allocation3 + $0x164] ss:$8 sps:$4 sm:$0xff]   ;;  %v1877_v49 = vld [vmem:[#allocation3 + $0x74] ss:$8 sps:$4 sm:$0xff]  }
  0x22   :  { %v51_v48 = vld [vmem:[%s2664_s0 + $0x40] sm:$0xff]  ;;  %v52_v50 = vld [vmem:[%s2664_s0 + $0x48] sm:$0xff]  ;;  %v1875_v52 = vld [vmem:[#allocation3 + $0x70] ss:$8 sps:$4 sm:$0xff]  }
  0x23   :  { %1011 = vmatpush1.bf16.msra.mxu1 %v1839_v18  ;;  %1124 = vmatpush1.bf16.msra.mxu0 %v1842_v22  ;;  %v1872_v51 = vld [vmem:[#allocation3 + $0x160] ss:$8 sps:$4 sm:$0xff]   ;;  %v1880_v53 = vld [vmem:[#allocation3 + $0x174] ss:$8 sps:$4 sm:$0xff]   ;;  %v63_v54 = vpack.c.bf16 %v52_v50, %v51_v48  ;;  %v1878_v55 = vld [vmem:[#allocation3 + $0x170] ss:$8 sps:$4 sm:$0xff]  }
  0x24   :  { %1012 = vmatprep.subr.bf16.mxu1 %v1847_v23  ;;  %1125 = vmatprep.subr.bf16.mxu0 %v1850_v25  ;;  %v1883_v56 = vld [vmem:[#allocation3 + $0x84] ss:$8 sps:$4 sm:$0xff]   ;;  %v1881_v57 = vld [vmem:[#allocation3 + $0x80] ss:$8 sps:$4 sm:$0xff]   ;;  %v53_v59 = vld [vmem:[%s2664_s0 + $0x50] sm:$0xff] }
  0x25   :  { %1673 = vmatmul.mubr.msk.bf16.gmra.mrb[4].mxu0 %vm137_vm0, %v60_v20  ;;  %1681 = vmatmul.mubr.msk.bf16.gmra.mrb[4].mxu1 %vm137_vm0, %v60_v20  ;;  %v1886_v58 = vld [vmem:[#allocation3 + $0x184] ss:$8 sps:$4 sm:$0xff]   ;;  %v1889_v60 = vld [vmem:[#allocation3 + $0x94] ss:$8 sps:$4 sm:$0xff]   ;;  %v1884_v62 = vld [vmem:[#allocation3 + $0x180] ss:$8 sps:$4 sm:$0xff]  }
  0x26   :  { %214 = vmatprep.mubr.bf16.mxu0 %v2044_v0  ;;  %327 = vmatprep.mubr.bf16.mxu1 %v2044_v0  ;;  %v54_v61 = vld [vmem:[%s2664_s0 + $0x58] sm:$0xff]  ;;  %v1895_v4 = vld [vmem:[#allocation3 + $0xa4] ss:$8 sps:$4 sm:$0xff]   ;;  %v1893_v5 = vld [vmem:[#allocation3 + $0xa0] ss:$8 sps:$4 sm:$0xff]  }
  0x27   :  { %1013 = vmatpush1.bf16.msra.mxu1 %v1845_v24  ;;  %1126 = vmatpush1.bf16.msra.mxu0 %v1848_v29  ;;  %v1887_v63 = vld [vmem:[#allocation3 + $0x90] ss:$8 sps:$4 sm:$0xff]   ;;  %v1892_v1 = vld [vmem:[#allocation3 + $0x194] ss:$8 sps:$4 sm:$0xff]   ;;  %v64_v2 = vpack.c.bf16 %v54_v61, %v53_v59  ;;  %v1898_v6 = vld [vmem:[#allocation3 + $0x1a4] ss:$8 sps:$4 sm:$0xff]  }
  0x28   :  { %1014 = vmatprep.subr.bf16.mxu1 %v1853_v27  ;;  %1127 = vmatprep.subr.bf16.mxu0 %v1856_v31  ;;  %v1890_v3 = vld [vmem:[#allocation3 + $0x190] ss:$8 sps:$4 sm:$0xff]   ;;  %v1901_v7 = vld [vmem:[#allocation3 + $0xb4] ss:$8 sps:$4 sm:$0xff]   ;;  %v55_v8 = vld [vmem:[%s2664_s0 + $0x60] sm:$0xff] }
  0x29   :  { %v56_v9 = vld [vmem:[%s2664_s0 + $0x68] sm:$0xff]  ;;  %v1899_v11 = vld [vmem:[#allocation3 + $0xb0] ss:$8 sps:$4 sm:$0xff]   ;;  %v1904_v12 = vld [vmem:[#allocation3 + $0x1b4] ss:$8 sps:$4 sm:$0xff]  }
  0x2a   :  { %v1896_v10 = vld [vmem:[#allocation3 + $0x1a0] ss:$8 sps:$4 sm:$0xff]   ;;  %v65_v13 = vpack.c.bf16 %v56_v9, %v55_v8  ;;  %v1902_v14 = vld [vmem:[#allocation3 + $0x1b0] ss:$8 sps:$4 sm:$0xff]   ;;  %v1907_v15 = vld [vmem:[#allocation3 + $0xc4] ss:$8 sps:$4 sm:$0xff]  }
  0x2b   :  { %1015 = vmatpush1.bf16.msra.mxu1 %v1851_v30  ;;  %1128 = vmatpush1.bf16.msra.mxu0 %v1854_v33  ;;  %v1905_v16 = vld [vmem:[#allocation3 + $0xc0] ss:$8 sps:$4 sm:$0xff]   ;;  %v1910_v17 = vld [vmem:[#allocation3 + $0x1c4] ss:$8 sps:$4 sm:$0xff]   ;;  %v1913_v18 = vld [vmem:[#allocation3 + $0xd4] ss:$8 sps:$4 sm:$0xff]   ;;  %v77_v33 = vlaneseq }
  0x2c   :  { %1016 = vmatprep.subr.bf16.mxu1 %v1859_v34  ;;  %1129 = vmatprep.subr.bf16.mxu0 %v1862_v36  ;;  %v57_v19 = vld [vmem:[%s2664_s0 + $0x70] sm:$0xff]  ;;  %v58_v20 = vld [vmem:[%s2664_s0 + $0x78] sm:$0xff]  ;;  %v1908_v21 = vld [vmem:[#allocation3 + $0x1c0] ss:$8 sps:$4 sm:$0xff]  }
  0x2d   :  { %1674 = vmatmul.mubr.msk.bf16.gmra.mrb[8].mxu0 %vm137_vm0, %v61_v32  ;;  %1682 = vmatmul.mubr.msk.bf16.gmra.mrb[8].mxu1 %vm137_vm0, %v61_v32  ;;  %v1911_v22 = vld [vmem:[#allocation3 + $0xd0] ss:$8 sps:$4 sm:$0xff]   ;;  %v66_v23 = vpack.c.bf16 %v58_v20, %v57_v19  ;;  %v1919_v25 = vld [vmem:[#allocation3 + $0xe4] ss:$8 sps:$4 sm:$0xff]   ;;  %v1917_v27 = vld [vmem:[#allocation3 + $0xe0] ss:$8 sps:$4 sm:$0xff]  }
  0x2e   :  { %224 = vmatprep.mubr.bf16.mxu0 %v2044_v0  ;;  %337 = vmatprep.mubr.bf16.mxu1 %v2044_v0  ;;  %v1914_v24 = vld [vmem:[#allocation3 + $0x1d0] ss:$8 sps:$4 sm:$0xff]   ;;  %v1922_v26 = vld [vmem:[#allocation3 + $0x1e4] ss:$8 sps:$4 sm:$0xff]   ;;  %v1920_v28 = vld [vmem:[#allocation3 + $0x1e0] ss:$8 sps:$4 sm:$0xff]  }
  0x2f   :  { %1017 = vmatpush1.bf16.msra.mxu1 %v1857_v35  ;;  %1130 = vmatpush1.bf16.msra.mxu0 %v1860_v40  ;;  %v1925_v29 = vld [vmem:[#allocation3 + $0xf4] ss:$8 sps:$4 sm:$0xff]   ;;  %v1923_v31 = vld [vmem:[#allocation3 + $0xf0] ss:$8 sps:$4 sm:$0xff]   ;;  %v2203_v34 = vshrl.u32 %v77_v33, 7 }
  0x30   :  { %1018 = vmatprep.subr.bf16.mxu1 %v1865_v38  ;;  %1131 = vmatprep.subr.bf16.mxu0 %v1868_v42  ;;  %v1928_v30 = vld [vmem:[#allocation3 + $0x1f4] ss:$8 sps:$4 sm:$0xff]   ;;  %v1926_v32 = vld [vmem:[#allocation3 + $0x1f0] ss:$8 sps:$4 sm:$0xff]   ;;  %v75_v37 = vld [vmem:[%s2666_s2] sm:$0xf] }
  0x31   :  { %v2206_v35 = vsub.s32 0, %v2203_v34  ;;  %v87_v36 = vsub.s32 2, %v2203_v34  ;;  %v2213_v38 = vsub.s32 1, %v2203_v34  ;;  %v91_v39 = vsub.s32 3, %v2203_v34 }
  0x33   :  { %1019 = vmatpush1.bf16.msra.mxu1 %v1863_v41  ;;  %1132 = vmatpush1.bf16.msra.mxu0 %v1866_v44  ;;  %v2217_v40 = vrot.slane %v75_v37, %v2206_v35  ;;  %v2219_v41 = vrot.slane %v75_v37, %v87_v36  ;;  %v2222_v42 = vrot.slane %v75_v37, %v2213_v38 }
  0x34   :  { %1020 = vmatprep.subr.bf16.mxu1 %v1871_v45  ;;  %1133 = vmatprep.subr.bf16.mxu0 %v1874_v47 }
  0x35   :  { %1675 = vmatmul.mubr.msk.bf16.gmra.mrb[12].mxu0 %vm137_vm0, %v62_v43  ;;  %1683 = vmatmul.mubr.msk.bf16.gmra.mrb[12].mxu1 %vm137_vm0, %v62_v43  ;;  %v2224_v43 = vrot.slane %v75_v37, %v91_v39 }
  0x36   :  { %234 = vmatprep.mubr.bf16.mxu0 %v2044_v0  ;;  %347 = vmatprep.mubr.bf16.mxu1 %v2044_v0 }
  0x37   :  { %1021 = vmatpush1.bf16.msra.mxu1 %v1869_v46  ;;  %1134 = vmatpush1.bf16.msra.mxu0 %v1872_v51 }
  0x38   :  { %1022 = vmatprep.subr.bf16.mxu1 %v1877_v49  ;;  %1135 = vmatprep.subr.bf16.mxu0 %v1880_v53 }
  0x3b   :  { %1023 = vmatpush1.bf16.msra.mxu1 %v1875_v52  ;;  %1136 = vmatpush1.bf16.msra.mxu0 %v1878_v55 }
  0x3c   :  { %1024 = vmatprep.subr.bf16.mxu1 %v1883_v56  ;;  %1137 = vmatprep.subr.bf16.mxu0 %v1886_v58 }
  0x3d   :  { %1676 = vmatmul.mubr.msk.bf16.gmra.mrb[16].mxu0 %vm137_vm0, %v63_v54  ;;  %1684 = vmatmul.mubr.msk.bf16.gmra.mrb[16].mxu1 %vm137_vm0, %v63_v54 }
  0x3e   :  { %244 = vmatprep.mubr.bf16.mxu0 %v2044_v0  ;;  %357 = vmatprep.mubr.bf16.mxu1 %v2044_v0 }
  0x3f   :  { %1025 = vmatpush1.bf16.msra.mxu1 %v1881_v57  ;;  %1138 = vmatpush1.bf16.msra.mxu0 %v1884_v62 }
  0x40   :  { %1026 = vmatprep.subr.bf16.mxu1 %v1889_v60  ;;  %1139 = vmatprep.subr.bf16.mxu0 %v1892_v1 }
  0x43   :  { %1027 = vmatpush1.bf16.msra.mxu1 %v1887_v63  ;;  %1140 = vmatpush1.bf16.msra.mxu0 %v1890_v3 }
  0x44   :  { %1028 = vmatprep.subr.bf16.mxu1 %v1895_v4  ;;  %1141 = vmatprep.subr.bf16.mxu0 %v1898_v6 }
  0x45   :  { %1677 = vmatmul.mubr.msk.bf16.gmra.mrb[20].mxu0 %vm137_vm0, %v64_v2  ;;  %1685 = vmatmul.mubr.msk.bf16.gmra.mrb[20].mxu1 %vm137_vm0, %v64_v2 }
  0x46   :  { %254 = vmatprep.mubr.bf16.mxu0 %v2044_v0  ;;  %367 = vmatprep.mubr.bf16.mxu1 %v2044_v0 }
  0x47   :  { %1029 = vmatpush1.bf16.msra.mxu1 %v1893_v5  ;;  %1142 = vmatpush1.bf16.msra.mxu0 %v1896_v10 }
  0x48   :  { %1030 = vmatprep.subr.bf16.mxu1 %v1901_v7  ;;  %1143 = vmatprep.subr.bf16.mxu0 %v1904_v12 }
  0x4b   :  { %1031 = vmatpush1.bf16.msra.mxu1 %v1899_v11  ;;  %1144 = vmatpush1.bf16.msra.mxu0 %v1902_v14 }
  0x4c   :  { %1032 = vmatprep.subr.bf16.mxu1 %v1907_v15  ;;  %1145 = vmatprep.subr.bf16.mxu0 %v1910_v17 }
  0x4d   :  { %1678 = vmatmul.mubr.msk.bf16.gmra.mrb[24].mxu0 %vm137_vm0, %v65_v13  ;;  %1686 = vmatmul.mubr.msk.bf16.gmra.mrb[24].mxu1 %vm137_vm0, %v65_v13 }
  0x4e   :  { %264 = vmatprep.mubr.bf16.mxu0 %v2044_v0  ;;  %377 = vmatprep.mubr.bf16.mxu1 %v2044_v0  ;;  %v1916_v0 = vld [vmem:[#allocation3 + $0x1d4] ss:$8 sps:$4 sm:$0xff]  }
  0x4f   :  { %1033 = vmatpush1.bf16.msra.mxu1 %v1905_v16  ;;  %1146 = vmatpush1.bf16.msra.mxu0 %v1908_v21 }
  0x50   :  { %1034 = vmatprep.subr.bf16.mxu1 %v1913_v18  ;;  %1147 = vmatprep.subr.bf16.mxu0 %v1916_v0 }
  0x53   :  { %1035 = vmatpush1.bf16.msra.mxu1 %v1911_v22  ;;  %1148 = vmatpush1.bf16.msra.mxu0 %v1914_v24 }
  0x54   :  { %1036 = vmatprep.subr.bf16.mxu1 %v1919_v25  ;;  %1149 = vmatprep.subr.bf16.mxu0 %v1922_v26 }
  0x55   :  { %1679 = vmatmul.mubr.msk.bf16.gmra.mrb[28].mxu0 %vm137_vm0, %v66_v23  ;;  %1687 = vmatmul.mubr.msk.bf16.gmra.mrb[28].mxu1 %vm137_vm0, %v66_v23 }
  0x57   :  { %1037 = vmatpush1.bf16.msra.mxu1 %v1917_v27  ;;  %1150 = vmatpush1.bf16.msra.mxu0 %v1920_v28 }
  0x58   :  { %1038 = vmatprep.subr.bf16.mxu1 %v1925_v29  ;;  %1151 = vmatprep.subr.bf16.mxu0 %v1928_v30 }
  0x5b   :  { %1039 = vmatpush1.bf16.msra.mxu1 %v1923_v31  ;;  %1152 = vmatpush1.bf16.msra.mxu0 %v1926_v32 }
  0xf0   :  { %v196_v44 = vpop.f32.mrb[0].mxu0  ;;  %v309_v45 = vpop.f32.mrb[0].mxu1 }
  0xf1   :  { %v197_v46 = vadd.f32 %v196_v44, %v2217_v40  ;;  %v310_v47 = vadd.f32 %v309_v45, %v2219_v41  ;;  %v198_v48 = vpop.f32.mrb[1].mxu0  ;;  %v311_v49 = vpop.f32.mrb[1].mxu1 }
  0xf2   :  { %v199_v50 = vadd.f32 %v198_v48, %v2222_v42  ;;  %v312_v51 = vadd.f32 %v311_v49, %v2224_v43  ;;  %v200_v52 = vpop.f32.mrb[2].mxu0  ;;  %v313_v53 = vpop.f32.mrb[2].mxu1 }
  0xf3   :  { %vm388_vm1 = vcmp.gt.f32.partialorder %v197_v46, 0.0  ;;  %v452_v54 = vmul.f32 0.2, %v197_v46  ;;  %vm390_vm2 = vcmp.gt.f32.partialorder %v310_v47, 0.0  ;;  %v454_v55 = vmul.f32 0.2, %v310_v47 }
  0xf4   :  { %vm389_vm3 = vcmp.gt.f32.partialorder %v199_v50, 0.0  ;;  %v453_v56 = vmul.f32 0.2, %v199_v50  ;;  %v201_v57 = vadd.f32 %v200_v52, %v2217_v40  ;;  %v314_v58 = vadd.f32 %v313_v53, %v2219_v41  ;;  %v202_v59 = vpop.f32.mrb[3].mxu0  ;;  %v315_v60 = vpop.f32.mrb[3].mxu1 }
  0xf5   :  { %vm391_vm4 = vcmp.gt.f32.partialorder %v312_v51, 0.0  ;;  %v455_v61 = vmul.f32 0.2, %v312_v51  ;;  %v203_v62 = vadd.f32 %v202_v59, %v2222_v42  ;;  %v316_v63 = vadd.f32 %v315_v60, %v2224_v43 }
  0xf6   :  { %vm392_vm5 = vcmp.gt.f32.partialorder %v201_v57, 0.0  ;;  %v456_v1 = vmul.f32 0.2, %v201_v57  ;;  %vm394_vm6 = vcmp.gt.f32.partialorder %v314_v58, 0.0  ;;  %v458_v2 = vmul.f32 0.2, %v314_v58 }
  0xf7   :  { %vm393_vm7 = vcmp.gt.f32.partialorder %v203_v62, 0.0  ;;  %v457_v3 = vmul.f32 0.2, %v203_v62  ;;  %vm395_vm8 = vcmp.gt.f32.partialorder %v316_v63, 0.0  ;;  %v459_v4 = vmul.f32 0.2, %v316_v63 }
  0xf8   :  { %v516_v5 = vsel %vm388_vm1, %v197_v46, %v452_v54  ;;  %v518_v6 = vsel %vm390_vm2, %v310_v47, %v454_v55  ;;  %v520_v7 = vsel %vm392_vm5, %v201_v57, %v456_v1  ;;  %v522_v8 = vsel %vm394_vm6, %v314_v58, %v458_v2  ;;  %v206_v9 = vpop.f32.mrb[4].mxu0  ;;  %v319_v10 = vpop.f32.mrb[4].mxu1 }
  0xf9   :  { %v580_v11 = vpack.c.bf16 %v520_v7, %v516_v5  ;;  %v582_v12 = vpack.c.bf16 %v522_v8, %v518_v6  ;;  %v207_v13 = vadd.f32 %v206_v9, %v2217_v40  ;;  %v320_v14 = vadd.f32 %v319_v10, %v2219_v41  ;;  %v208_v15 = vpop.f32.mrb[5].mxu0  ;;  %v321_v16 = vpop.f32.mrb[5].mxu1 }
  0xfa   :  { %v209_v17 = vadd.f32 %v208_v15, %v2222_v42  ;;  %v322_v18 = vadd.f32 %v321_v16, %v2224_v43  ;;  %v210_v19 = vpop.f32.mrb[6].mxu0  ;;  %v323_v20 = vpop.f32.mrb[6].mxu1  ;;  %v521_v21 = vsel %vm393_vm7, %v203_v62, %v457_v3  ;;  %v523_v22 = vsel %vm395_vm8, %v316_v63, %v459_v4 }
  0xfb   :  { %v460_v23 = vmul.f32 0.2, %v207_v13  ;;  %v517_v0 = vsel %vm389_vm3, %v199_v50, %v453_v56  ;;  %v519_v24 = vsel %vm391_vm4, %v312_v51, %v455_v61  ;;  %vm396_vm9 = vcmp.gt.f32.partialorder %v207_v13, 0.0  ;;  %v212_v29 = vpop.f32.mrb[7].mxu0  ;;  %v325_v30 = vpop.f32.mrb[7].mxu1 }
  0xfc   :  { %vm398_vm10 = vcmp.gt.f32.partialorder %v320_v14, 0.0  ;;  %v461_v25 = vmul.f32 0.2, %v209_v17  ;;  %v463_v26 = vmul.f32 0.2, %v322_v18  ;;  %v211_v27 = vadd.f32 %v210_v19, %v2217_v40 }
  0xfd   :  { %v324_v28 = vadd.f32 %v323_v20, %v2219_v41  ;;  %v581_v31 = vpack.c.bf16 %v521_v21, %v517_v0  ;;  %v583_v32 = vpack.c.bf16 %v523_v22, %v519_v24  ;;  %vm397_vm11 = vcmp.gt.f32.partialorder %v209_v17, 0.0 }
  0xfe   :  { %vm399_vm12 = vcmp.gt.f32.partialorder %v322_v18, 0.0  ;;  %v213_v36 = vadd.f32 %v212_v29, %v2222_v42  ;;  %v326_v37 = vadd.f32 %v325_v30, %v2224_v43  ;;  %vm400_vm13 = vcmp.gt.f32.partialorder %v211_v27, 0.0 }
  0xff   :  { %v464_v39 = vmul.f32 0.2, %v211_v27  ;;  %vm402_vm14 = vcmp.gt.f32.partialorder %v324_v28, 0.0  ;;  %v466_v44 = vmul.f32 0.2, %v324_v28  ;;  %1040 = vmatprep.mubr.bf16.mxu1 %v581_v31  ;;  %1153 = vmatprep.mubr.bf16.mxu0 %v583_v32  ;;  %v525_v50 = vsel %vm397_vm11, %v209_v17, %v461_v25 }
 0x100   :  { %vm401_vm15 = vcmp.gt.f32.partialorder %v213_v36, 0.0  ;;  %v465_v45 = vmul.f32 0.2, %v213_v36  ;;  %vm403_vm0 = vcmp.gt.f32.partialorder %v326_v37, 0.0  ;;  %v467_v46 = vmul.f32 0.2, %v326_v37  ;;  %1041 = vmatmul.mubr.bf16.vlgmr.msra.gmra.mrb[32].mxu1 %v580_v11  ;;  %1154 = vmatmul.mubr.bf16.vlgmr.msra.gmra.mrb[32].mxu0 %v582_v12 }
 0x101   :  { %v462_v47 = vmul.f32 0.2, %v320_v14  ;;  %v216_v48 = vpop.f32.mrb[8].mxu0  ;;  %v329_v49 = vpop.f32.mrb[8].mxu1  ;;  %v527_v51 = vsel %vm399_vm12, %v322_v18, %v463_v26  ;;  %v528_v52 = vsel %vm400_vm13, %v211_v27, %v464_v39  ;;  %v530_v58 = vsel %vm402_vm14, %v324_v28, %v466_v44 }
 0x102   :  { %v217_v53 = vadd.f32 %v216_v48, %v2217_v40  ;;  %v218_v54 = vpop.f32.mrb[9].mxu0  ;;  %v331_v55 = vpop.f32.mrb[9].mxu1  ;;  %v529_v56 = vsel %vm401_vm15, %v213_v36, %v465_v45  ;;  %v531_v57 = vsel %vm403_vm0, %v326_v37, %v467_v46  ;;  %v2256_v3 = vadd.f32 %v329_v49, %v2219_v41 }
 0x103   :  { %v219_v59 = vadd.f32 %v218_v54, %v2222_v42  ;;  %v332_v60 = vadd.f32 %v331_v55, %v2224_v43  ;;  %v220_v61 = vpop.f32.mrb[10].mxu0  ;;  %v333_v62 = vpop.f32.mrb[10].mxu1  ;;  %v585_v63 = vpack.c.bf16 %v529_v56, %v525_v50  ;;  %v587_v1 = vpack.c.bf16 %v531_v57, %v527_v51 }
 0x104   :  { %v468_v2 = vmul.f32 0.2, %v217_v53  ;;  %v524_v4 = vsel %vm396_vm9, %v207_v13, %v460_v23  ;;  %v526_v5 = vsel %vm398_vm10, %v320_v14, %v462_v47  ;;  %v221_v6 = vadd.f32 %v220_v61, %v2217_v40  ;;  %v222_v7 = vpop.f32.mrb[11].mxu0  ;;  %v335_v8 = vpop.f32.mrb[11].mxu1 }
 0x105   :  { %1050 = vmatprep.mubr.bf16.mxu1 %v585_v63  ;;  %1163 = vmatprep.mubr.bf16.mxu0 %v587_v1  ;;  %vm405_vm1 = vcmp.gt.f32.partialorder %v219_v59, 0.0  ;;  %v584_v9 = vpack.c.bf16 %v528_v52, %v524_v4  ;;  %v586_v10 = vpack.c.bf16 %v530_v58, %v526_v5  ;;  %v469_v11 = vmul.f32 0.2, %v219_v59 }
 0x106   :  { %vm407_vm2 = vcmp.gt.f32.partialorder %v332_v60, 0.0  ;;  %v223_v12 = vadd.f32 %v222_v7, %v2222_v42  ;;  %v336_v15 = vadd.f32 %v335_v8, %v2224_v43  ;;  %v471_v18 = vmul.f32 0.2, %v332_v60 }
 0x107   :  { %vm408_vm3 = vcmp.gt.f32.partialorder %v221_v6, 0.0  ;;  %v472_v13 = vmul.f32 0.2, %v221_v6  ;;  %v334_v14 = vadd.f32 %v333_v62, %v2219_v41  ;;  %vm404_vm6 = vcmp.gt.f32.partialorder %v217_v53, 0.0 }
 0x108   :  { %v226_v16 = vpop.f32.mrb[12].mxu0  ;;  %v339_v17 = vpop.f32.mrb[12].mxu1  ;;  %1051 = vmatmul.mubr.bf16.gmra.mrb[36].mxu1 %v584_v9  ;;  %1164 = vmatmul.mubr.bf16.gmra.mrb[36].mxu0 %v586_v10  ;;  %vm409_vm4 = vcmp.gt.f32.partialorder %v223_v12, 0.0  ;;  %v473_v19 = vmul.f32 0.2, %v223_v12  ;;  %vm411_vm5 = vcmp.gt.f32.partialorder %v336_v15, 0.0  ;;  %v533_v30 = vsel %vm405_vm1, %v219_v59, %v469_v11 }
 0x109   :  { %v475_v20 = vmul.f32 0.2, %v336_v15  ;;  %vm406_vm7 = vcmp.gt.f32.partialorder %v2256_v3, 0.0  ;;  %v2266_v21 = vadd.f32 %v226_v16, %v2217_v40  ;;  %v228_v22 = vpop.f32.mrb[13].mxu0  ;;  %v341_v23 = vpop.f32.mrb[13].mxu1  ;;  %v2270_v24 = vadd.f32 %v339_v17, %v2219_v41 }
 0x10a   :  { %v470_v0 = vmul.f32 0.2, %v2256_v3  ;;  %v230_v25 = vpop.f32.mrb[14].mxu0  ;;  %v343_v26 = vpop.f32.mrb[14].mxu1  ;;  %v537_v27 = vsel %vm409_vm4, %v223_v12, %v473_v19  ;;  %v229_v29 = vadd.f32 %v228_v22, %v2222_v42  ;;  %v535_v31 = vsel %vm407_vm2, %v332_v60, %v471_v18 }
 0x10b   :  { %v539_v28 = vsel %vm411_vm5, %v336_v15, %v475_v20  ;;  %v536_v32 = vsel %vm408_vm3, %v221_v6, %v472_v13  ;;  %vm410_vm8 = vcmp.gt.f32.partialorder %v334_v14, 0.0  ;;  %v474_v36 = vmul.f32 0.2, %v334_v14  ;;  %v232_v45 = vpop.f32.mrb[15].mxu0  ;;  %v345_v46 = vpop.f32.mrb[15].mxu1 }
 0x10c   :  { %v2277_v37 = vadd.f32 %v341_v23, %v2224_v43  ;;  %v532_v39 = vsel %vm404_vm6, %v217_v53, %v468_v2  ;;  %vm412_vm9 = vcmp.gt.f32.partialorder %v2266_v21, 0.0  ;;  %v2282_v44 = vmul.f32 0.2, %v2266_v21 }
 0x10d   :  { %v589_v47 = vpack.c.bf16 %v537_v27, %v533_v30  ;;  %v591_v48 = vpack.c.bf16 %v539_v28, %v535_v31  ;;  %vm414_vm10 = vcmp.gt.f32.partialorder %v2270_v24, 0.0  ;;  %v233_v49 = vadd.f32 %v232_v45, %v2222_v42 }
 0x10e   :  { %v346_v50 = vadd.f32 %v345_v46, %v2224_v43  ;;  %v588_v51 = vpack.c.bf16 %v536_v32, %v532_v39  ;;  %v478_v53 = vmul.f32 0.2, %v2270_v24  ;;  %vm413_vm11 = vcmp.gt.f32.partialorder %v229_v29, 0.0 }
 0x10f   :  { %v477_v55 = vmul.f32 0.2, %v229_v29  ;;  %v231_v56 = vadd.f32 %v230_v25, %v2217_v40  ;;  %1060 = vmatprep.mubr.bf16.mxu1 %v589_v47  ;;  %1173 = vmatprep.mubr.bf16.mxu0 %v591_v48  ;;  %vm415_vm12 = vcmp.gt.f32.partialorder %v2277_v37, 0.0  ;;  %v344_v57 = vadd.f32 %v343_v26, %v2219_v41 }
 0x110   :  { %v236_v52 = vpop.f32.mrb[16].mxu0  ;;  %v349_v54 = vpop.f32.mrb[16].mxu1  ;;  %vm417_vm13 = vcmp.gt.f32.partialorder %v233_v49, 0.0  ;;  %v481_v58 = vmul.f32 0.2, %v233_v49  ;;  %1061 = vmatmul.mubr.bf16.gmra.mrb[40].mxu1 %v588_v51  ;;  %v534_v59 = vsel %vm406_vm7, %v2256_v3, %v470_v0  ;;  %v538_v60 = vsel %vm410_vm8, %v334_v14, %v474_v36 }
 0x111   :  { %v2296_v61 = vadd.f32 %v236_v52, %v2217_v40  ;;  %v2299_v62 = vadd.f32 %v349_v54, %v2219_v41  ;;  %v238_v63 = vpop.f32.mrb[17].mxu0  ;;  %v351_v1 = vpop.f32.mrb[17].mxu1  ;;  %v483_v2 = vmul.f32 0.2, %v346_v50  ;;  %v590_v4 = vpack.c.bf16 %v538_v60, %v534_v59 }
 0x112   :  { %v2302_v5 = vadd.f32 %v238_v63, %v2222_v42  ;;  %v240_v6 = vpop.f32.mrb[18].mxu0  ;;  %v353_v7 = vpop.f32.mrb[18].mxu1  ;;  %v545_v8 = vsel %vm417_vm13, %v233_v49, %v481_v58  ;;  %v479_v3 = vmul.f32 0.2, %v2277_v37  ;;  %vm416_vm14 = vcmp.gt.f32.partialorder %v231_v56, 0.0 }
 0x113   :  { %vm419_vm15 = vcmp.gt.f32.partialorder %v346_v50, 0.0  ;;  %v2306_v9 = vadd.f32 %v351_v1, %v2224_v43  ;;  %v480_v10 = vmul.f32 0.2, %v231_v56  ;;  %vm418_vm0 = vcmp.gt.f32.partialorder %v344_v57, 0.0  ;;  %1174 = vmatmul.mubr.bf16.gmra.mrb[40].mxu0 %v590_v4  ;;  %v242_v18 = vpop.f32.mrb[19].mxu0  ;;  %v355_v13 = vpop.f32.mrb[19].mxu1 }
 0x114   :  { %v482_v11 = vmul.f32 0.2, %v344_v57  ;;  %v541_v12 = vsel %vm413_vm11, %v229_v29, %v477_v55  ;;  %v2310_v15 = vmul.f32 0.2, %v2296_v61  ;;  %v2313_v16 = vmul.f32 0.2, %v2299_v62 }
 0x115   :  { %v2316_v17 = vadd.f32 %v240_v6, %v2217_v40  ;;  %v593_v14 = vpack.c.bf16 %v545_v8, %v541_v12  ;;  %vm420_vm1 = vcmp.gt.f32.partialorder %v2296_v61, 0.0  ;;  %vm421_vm2 = vcmp.gt.f32.partialorder %v2302_v5, 0.0 }
 0x116   :  { %v485_v19 = vmul.f32 0.2, %v2302_v5  ;;  %v547_v20 = vsel %vm419_vm15, %v346_v50, %v483_v2  ;;  %vm422_vm3 = vcmp.gt.f32.partialorder %v2299_v62, 0.0  ;;  %vm423_vm4 = vcmp.gt.f32.partialorder %v2306_v9, 0.0 }
 0x117   :  { %v487_v0 = vmul.f32 0.2, %v2306_v9  ;;  %v2326_v25 = vadd.f32 %v353_v7, %v2219_v41  ;;  %v243_v26 = vadd.f32 %v242_v18, %v2222_v42  ;;  %1070 = vmatprep.mubr.bf16.mxu1 %v593_v14  ;;  %vm424_vm5 = vcmp.gt.f32.partialorder %v2316_v17, 0.0 }
 0x118   :  { %v246_v22 = vpop.f32.mrb[20].mxu0  ;;  %v359_v23 = vpop.f32.mrb[20].mxu1  ;;  %v356_v27 = vadd.f32 %v355_v13, %v2224_v43  ;;  %v543_v28 = vsel %vm415_vm12, %v2277_v37, %v479_v3  ;;  %v540_v29 = vsel %vm412_vm9, %v2266_v21, %v2282_v44  ;;  %v544_v31 = vsel %vm416_vm14, %v231_v56, %v480_v10 }
 0x119   :  { %v595_v30 = vpack.c.bf16 %v547_v20, %v543_v28  ;;  %v542_v32 = vsel %vm414_vm10, %v2270_v24, %v478_v53  ;;  %v546_v36 = vsel %vm418_vm0, %v344_v57, %v482_v11  ;;  %v248_v39 = vpop.f32.mrb[21].mxu0  ;;  %v361_v45 = vpop.f32.mrb[21].mxu1  ;;  %v592_v46 = vpack.c.bf16 %v544_v31, %v540_v29 }
 0x11a   :  { %v594_v47 = vpack.c.bf16 %v546_v36, %v542_v32  ;;  %v2344_v37 = vadd.f32 %v246_v22, %v2217_v40  ;;  %v2347_v48 = vadd.f32 %v359_v23, %v2219_v41  ;;  %v250_v21 = vpop.f32.mrb[22].mxu0  ;;  %v363_v44 = vpop.f32.mrb[22].mxu1  ;;  %v488_v49 = vmul.f32 0.2, %v2316_v17 }
 0x11b   :  { %v489_v50 = vmul.f32 0.2, %v243_v26  ;;  %1183 = vmatprep.mubr.bf16.mxu0 %v595_v30  ;;  %v2351_v24 = vadd.f32 %v248_v39, %v2222_v42  ;;  %v2354_v51 = vadd.f32 %v361_v45, %v2224_v43  ;;  %v252_v52 = vpop.f32.mrb[23].mxu0  ;;  %v365_v54 = vpop.f32.mrb[23].mxu1  ;;  %vm425_vm6 = vcmp.gt.f32.partialorder %v243_v26, 0.0  ;;  %1071 = vmatmul.mubr.bf16.gmra.mrb[44].mxu1 %v592_v46 }
 0x11c   :  { %v491_v53 = vmul.f32 0.2, %v356_v27  ;;  %1184 = vmatmul.mubr.bf16.gmra.mrb[44].mxu0 %v594_v47  ;;  %v2357_v55 = vadd.f32 %v250_v21, %v2217_v40  ;;  %v2360_v56 = vadd.f32 %v363_v44, %v2219_v41  ;;  %vm426_vm7 = vcmp.gt.f32.partialorder %v2326_v25, 0.0 }
 0x11d   :  { %v490_v57 = vmul.f32 0.2, %v2326_v25  ;;  %vm427_vm8 = vcmp.gt.f32.partialorder %v356_v27, 0.0  ;;  %v2365_v58 = vmul.f32 0.2, %v2344_v37  ;;  %vm428_vm9 = vcmp.gt.f32.partialorder %v2344_v37, 0.0 }
 0x11e   :  { %v2369_v59 = vmul.f32 0.2, %v2347_v48  ;;  %vm429_vm10 = vcmp.gt.f32.partialorder %v2351_v24, 0.0  ;;  %v493_v60 = vmul.f32 0.2, %v2351_v24  ;;  %vm431_vm11 = vcmp.gt.f32.partialorder %v2354_v51, 0.0 }
 0x11f   :  { %v495_v63 = vmul.f32 0.2, %v2354_v51  ;;  %v253_v1 = vadd.f32 %v252_v52, %v2222_v42  ;;  %v549_v2 = vsel %vm421_vm2, %v2302_v5, %v485_v19  ;;  %v553_v4 = vsel %vm425_vm6, %v243_v26, %v489_v50 }
 0x120   :  { %v256_v6 = vpop.f32.mrb[24].mxu0  ;;  %v369_v7 = vpop.f32.mrb[24].mxu1  ;;  %vm430_vm12 = vcmp.gt.f32.partialorder %v2347_v48, 0.0  ;;  %vm432_vm13 = vcmp.gt.f32.partialorder %v2357_v55, 0.0  ;;  %v2383_v8 = vmul.f32 0.2, %v2357_v55  ;;  %v597_v10 = vpack.c.bf16 %v553_v4, %v549_v2 }
 0x121   :  { %v2386_v3 = vmul.f32 0.2, %v2360_v56  ;;  %v555_v11 = vsel %vm427_vm8, %v356_v27, %v491_v53  ;;  %v258_v12 = vpop.f32.mrb[25].mxu0  ;;  %v371_v18 = vpop.f32.mrb[25].mxu1  ;;  %v497_v5 = vmul.f32 0.2, %v253_v1  ;;  %v366_v13 = vadd.f32 %v365_v54, %v2224_v43 }
 0x122   :  { %v551_v14 = vsel %vm423_vm4, %v2306_v9, %v487_v0  ;;  %v548_v19 = vsel %vm420_vm1, %v2296_v61, %v2310_v15  ;;  %1080 = vmatprep.mubr.bf16.mxu1 %v597_v10  ;;  %v552_v22 = vsel %vm424_vm5, %v2316_v17, %v488_v49  ;;  %v550_v23 = vsel %vm422_vm3, %v2299_v62, %v2313_v16  ;;  %v260_v0 = vpop.f32.mrb[26].mxu0  ;;  %v373_v26 = vpop.f32.mrb[26].mxu1 }
 0x123   :  { %v599_v20 = vpack.c.bf16 %v555_v11, %v551_v14  ;;  %v554_v9 = vsel %vm426_vm7, %v2326_v25, %v490_v57  ;;  %v596_v27 = vpack.c.bf16 %v552_v22, %v548_v19  ;;  %v2408_v61 = vadd.f32 %v256_v6, %v2217_v40  ;;  %v262_v17 = vpop.f32.mrb[27].mxu0  ;;  %v375_v29 = vpop.f32.mrb[27].mxu1 }
 0x124   :  { %v598_v28 = vpack.c.bf16 %v554_v9, %v550_v23  ;;  %v2411_v15 = vadd.f32 %v369_v7, %v2219_v41  ;;  %v2414_v30 = vadd.f32 %v258_v12, %v2222_v42  ;;  %v2417_v62 = vadd.f32 %v371_v18, %v2224_v43 }
 0x125   :  { %1193 = vmatprep.mubr.bf16.mxu0 %v599_v20  ;;  %v2420_v16 = vadd.f32 %v260_v0, %v2217_v40  ;;  %v2423_v25 = vadd.f32 %v373_v26, %v2219_v41  ;;  %vm434_vm14 = vcmp.gt.f32.partialorder %v2360_v56, 0.0  ;;  %vm433_vm15 = vcmp.gt.f32.partialorder %v253_v1, 0.0  ;;  %1081 = vmatmul.mubr.bf16.gmra.mrb[48].mxu1 %v596_v27 }
 0x126   :  { %v499_v31 = vmul.f32 0.2, %v366_v13  ;;  %1194 = vmatmul.mubr.bf16.gmra.mrb[48].mxu0 %v598_v28  ;;  %v2427_v32 = vmul.f32 0.2, %v2408_v61  ;;  %vm435_vm0 = vcmp.gt.f32.partialorder %v366_v13, 0.0  ;;  %vm437_vm1 = vcmp.gt.f32.partialorder %v2414_v30, 0.0 }
 0x127   :  { %v2430_v36 = vmul.f32 0.2, %v2411_v15  ;;  %v501_v39 = vmul.f32 0.2, %v2414_v30  ;;  %vm436_vm2 = vcmp.gt.f32.partialorder %v2408_v61, 0.0  ;;  %vm439_vm3 = vcmp.gt.f32.partialorder %v2417_v62, 0.0 }
 0x128   :  { %v503_v45 = vmul.f32 0.2, %v2417_v62  ;;  %v2438_v46 = vmul.f32 0.2, %v2420_v16  ;;  %v2441_v47 = vmul.f32 0.2, %v2423_v25  ;;  %v263_v21 = vadd.f32 %v262_v17, %v2222_v42 }
 0x129   :  { %v376_v44 = vadd.f32 %v375_v29, %v2224_v43  ;;  %v557_v49 = vsel %vm429_vm10, %v2351_v24, %v493_v60  ;;  %v561_v50 = vsel %vm433_vm15, %v253_v1, %v497_v5  ;;  %v266_v52 = vpop.f32.mrb[28].mxu0  ;;  %v379_v54 = vpop.f32.mrb[28].mxu1  ;;  %vm438_vm4 = vcmp.gt.f32.partialorder %v2411_v15, 0.0 }
 0x12a   :  { %vm440_vm5 = vcmp.gt.f32.partialorder %v2420_v16, 0.0  ;;  %vm442_vm6 = vcmp.gt.f32.partialorder %v2423_v25, 0.0  ;;  %v601_v53 = vpack.c.bf16 %v561_v50, %v557_v49  ;;  %v559_v57 = vsel %vm431_vm11, %v2354_v51, %v495_v63  ;;  %v268_v60 = vpop.f32.mrb[29].mxu0  ;;  %v381_v1 = vpop.f32.mrb[29].mxu1 }
 0x12b   :  { %v563_v2 = vsel %vm435_vm0, %v366_v13, %v499_v31  ;;  %v556_v24 = vsel %vm428_vm9, %v2344_v37, %v2365_v58  ;;  %vm441_vm7 = vcmp.gt.f32.partialorder %v263_v21, 0.0  ;;  %v505_v4 = vmul.f32 0.2, %v263_v21  ;;  %v270_v58 = vpop.f32.mrb[30].mxu0  ;;  %v383_v10 = vpop.f32.mrb[30].mxu1 }
 0x12c   :  { %vm443_vm8 = vcmp.gt.f32.partialorder %v376_v44, 0.0  ;;  %v507_v6 = vmul.f32 0.2, %v376_v44  ;;  %1090 = vmatprep.mubr.bf16.mxu1 %v601_v53  ;;  %v603_v7 = vpack.c.bf16 %v563_v2, %v559_v57  ;;  %v560_v51 = vsel %vm432_vm13, %v2357_v55, %v2383_v8  ;;  %v272_v13 = vpop.f32.mrb[31].mxu0  ;;  %v385_v55 = vpop.f32.mrb[31].mxu1 }
 0x12d   :  { %v558_v63 = vsel %vm430_vm12, %v2347_v48, %v2369_v59  ;;  %v562_v37 = vsel %vm434_vm14, %v2360_v56, %v2386_v3  ;;  %v600_v11 = vpack.c.bf16 %v560_v51, %v556_v24  ;;  %v267_v18 = vadd.f32 %v266_v52, %v2217_v40  ;;  %v676_v52 = vld [vmem:[%s2668_s4] sm:$0x3] }
 0x12e   :  { %v602_v12 = vpack.c.bf16 %v562_v37, %v558_v63  ;;  %v380_v5 = vadd.f32 %v379_v54, %v2219_v41  ;;  %1203 = vmatprep.mubr.bf16.mxu0 %v603_v7  ;;  %v269_v8 = vadd.f32 %v268_v60, %v2222_v42  ;;  %v382_v48 = vadd.f32 %v381_v1, %v2224_v43 }
 0x12f   :  { %v271_v59 = vadd.f32 %v270_v58, %v2217_v40  ;;  %v384_v14 = vadd.f32 %v383_v10, %v2219_v41  ;;  %1091 = vmatmul.mubr.bf16.gmra.mrb[52].mxu1 %v600_v11  ;;  %vm444_vm9 = vcmp.gt.f32.partialorder %v267_v18, 0.0  ;;  %v508_v56 = vmul.f32 0.2, %v267_v18 }
 0x130   :  { %1204 = vmatmul.mubr.bf16.gmra.mrb[52].mxu0 %v602_v12  ;;  %vm446_vm10 = vcmp.gt.f32.partialorder %v380_v5, 0.0  ;;  %v510_v3 = vmul.f32 0.2, %v380_v5  ;;  %vm445_vm11 = vcmp.gt.f32.partialorder %v269_v8, 0.0  ;;  %v509_v19 = vmul.f32 0.2, %v269_v8 }
 0x131   :  { %vm447_vm12 = vcmp.gt.f32.partialorder %v382_v48, 0.0  ;;  %v511_v20 = vmul.f32 0.2, %v382_v48  ;;  %vm448_vm13 = vcmp.gt.f32.partialorder %v271_v59, 0.0  ;;  %v512_v22 = vmul.f32 0.2, %v271_v59 }
 0x132   :  { %vm450_vm14 = vcmp.gt.f32.partialorder %v384_v14, 0.0  ;;  %v514_v23 = vmul.f32 0.2, %v384_v14  ;;  %v273_v9 = vadd.f32 %v272_v13, %v2222_v42  ;;  %v386_v40 = vadd.f32 %v385_v55, %v2224_v43 }
 0x133   :  { %v565_v41 = vsel %vm437_vm1, %v2414_v30, %v501_v39  ;;  %v569_v0 = vsel %vm441_vm7, %v263_v21, %v505_v4  ;;  %v567_v27 = vsel %vm439_vm3, %v2417_v62, %v503_v45  ;;  %v571_v28 = vsel %vm443_vm8, %v376_v44, %v507_v6  ;;  %v1330_v4 = vld [vmem:[%s2669_s5] sm:$0x3] }
 0x134   :  { %v605_v26 = vpack.c.bf16 %v569_v0, %v565_v41  ;;  %v564_v42 = vsel %vm436_vm2, %v2408_v61, %v2427_v32  ;;  %vm449_vm15 = vcmp.gt.f32.partialorder %v273_v9, 0.0  ;;  %v513_v43 = vmul.f32 0.2, %v273_v9 }
 0x135   :  { %vm451_vm0 = vcmp.gt.f32.partialorder %v386_v40, 0.0  ;;  %v515_v17 = vmul.f32 0.2, %v386_v40  ;;  %v607_v29 = vpack.c.bf16 %v571_v28, %v567_v27  ;;  %v568_v30 = vsel %vm440_vm5, %v2420_v16, %v2438_v46 }
 0x136   :  { %1100 = vmatprep.mubr.bf16.mxu1 %v605_v26  ;;  %v566_v62 = vsel %vm438_vm4, %v2411_v15, %v2430_v36  ;;  %v570_v61 = vsel %vm442_vm6, %v2423_v25, %v2441_v47  ;;  %v604_v31 = vpack.c.bf16 %v568_v30, %v564_v42  ;;  %v573_v39 = vsel %vm445_vm11, %v269_v8, %v509_v19 }
 0x137   :  { %v606_v32 = vpack.c.bf16 %v570_v61, %v566_v62  ;;  %v577_v45 = vsel %vm449_vm15, %v273_v9, %v513_v43  ;;  %1213 = vmatprep.mubr.bf16.mxu0 %v607_v29  ;;  %v575_v44 = vsel %vm447_vm12, %v382_v48, %v511_v20  ;;  %v579_v16 = vsel %vm451_vm0, %v386_v40, %v515_v17 }
 0x138   :  { %v609_v21 = vpack.c.bf16 %v577_v45, %v573_v39  ;;  %1101 = vmatmul.mubr.bf16.gmra.mrb[56].mxu1 %v604_v31  ;;  %v611_v46 = vpack.c.bf16 %v579_v16, %v575_v44  ;;  %v572_v15 = vsel %vm444_vm9, %v267_v18, %v508_v56  ;;  %v576_v36 = vsel %vm448_vm13, %v271_v59, %v512_v22 }
 0x139   :  { %1214 = vmatmul.mubr.bf16.gmra.mrb[56].mxu0 %v606_v32  ;;  %v608_v49 = vpack.c.bf16 %v576_v36, %v572_v15  ;;  %v574_v25 = vsel %vm446_vm10, %v380_v5, %v510_v3  ;;  %v578_v47 = vsel %vm450_vm14, %v384_v14, %v514_v23  ;;  %v2514_v54 = vrot.slane %v676_v52, %v2206_v35 }
 0x13a   :  { %1110 = vmatprep.mubr.bf16.mxu1 %v609_v21  ;;  %1223 = vmatprep.mubr.bf16.mxu0 %v611_v46  ;;  %v610_v50 = vpack.c.bf16 %v578_v47, %v574_v25  ;;  %v2517_v53 = vrot.slane %v676_v52, %v2213_v38  ;;  %v2527_v18 = vrot.slane %v1330_v4, %v2206_v35 }
 0x13b   :  { %v2530_v55 = vrot.slane %v1330_v4, %v2213_v38 }
 0x140   :  { %1111 = vmatmul.mubr.bf16.gmra.mrb[60].mxu1 %v608_v49 }
 0x141   :  { %1224 = vmatmul.mubr.bf16.gmra.mrb[60].mxu0 %v610_v50 }
 0x1d3   :  { %v1042_v57 = vpop.f32.mrb[32].mxu1  ;;  %v1155_v2 = vpop.f32.mrb[32].mxu0 }
 0x1d4   :  { %v1043_v24 = vadd.f32 %v1042_v57, %v2514_v54  ;;  %v1044_v60 = vpop.f32.mrb[33].mxu1  ;;  %v1157_v1 = vpop.f32.mrb[33].mxu0 }
 0x1d5   :  { %v1045_v6 = vadd.f32 %v1044_v60, %v2517_v53  ;;  %v1046_v7 = vpop.f32.mrb[34].mxu1  ;;  %v1159_v51 = vpop.f32.mrb[34].mxu0 }
 0x1d6   :  { %v1156_v63 = vadd.f32 %v1155_v2, %v1043_v24  ;;  %v1047_v37 = vadd.f32 %v1046_v7, %v2514_v54  ;;  %v1048_v58 = vpop.f32.mrb[35].mxu1  ;;  %v1161_v10 = vpop.f32.mrb[35].mxu0 }
 0x1d7   :  { %v1158_v11 = vadd.f32 %v1157_v1, %v1045_v6  ;;  %v1049_v12 = vadd.f32 %v1048_v58, %v2517_v53 }
 0x1d8   :  { %vm1234_vm1 = vcmp.gt.f32.partialorder %v1156_v63, 0.0  ;;  %v1266_v5 = vmul.f32 0.2, %v1156_v63  ;;  %v1160_v13 = vadd.f32 %v1159_v51, %v1047_v37 }
 0x1d9   :  { %vm1235_vm2 = vcmp.gt.f32.partialorder %v1158_v11, 0.0  ;;  %v1267_v8 = vmul.f32 0.2, %v1158_v11  ;;  %v1162_v48 = vadd.f32 %v1161_v10, %v1049_v12 }
 0x1da   :  { %vm1236_vm3 = vcmp.gt.f32.partialorder %v1160_v13, 0.0  ;;  %v1268_v59 = vmul.f32 0.2, %v1160_v13  ;;  %v1298_v14 = vsel %vm1234_vm1, %v1156_v63, %v1266_v5 }
 0x1db   :  { %vm1237_vm4 = vcmp.gt.f32.partialorder %v1162_v48, 0.0  ;;  %v1269_v56 = vmul.f32 0.2, %v1162_v48  ;;  %v1052_v3 = vpop.f32.mrb[36].mxu1  ;;  %v1165_v19 = vpop.f32.mrb[36].mxu0  ;;  %v1299_v20 = vsel %vm1235_vm2, %v1158_v11, %v1267_v8  ;;  %v1342_v35 = vmul.f32 %v2527_v18, %v1298_v14 }
 0x1dc   :  { %v1053_v22 = vadd.f32 %v1052_v3, %v2514_v54  ;;  %v1054_v23 = vpop.f32.mrb[37].mxu1  ;;  %v1167_v9 = vpop.f32.mrb[37].mxu0  ;;  %v1343_v38 = vmul.f32 %v2530_v55, %v1299_v20  ;;  %v1300_v40 = vsel %vm1236_vm3, %v1160_v13, %v1268_v59 }
 0x1dd   :  { %v1055_v41 = vadd.f32 %v1054_v23, %v2517_v53  ;;  %v1056_v0 = vpop.f32.mrb[38].mxu1  ;;  %v1169_v26 = vpop.f32.mrb[38].mxu0  ;;  %v1301_v27 = vsel %vm1237_vm4, %v1162_v48, %v1269_v56  ;;  %v1344_v28 = vmul.f32 %v2527_v18, %v1300_v40 }
 0x1de   :  { %v1166_v42 = vadd.f32 %v1165_v19, %v1053_v22  ;;  %v1057_v43 = vadd.f32 %v1056_v0, %v2514_v54  ;;  %v1058_v17 = vpop.f32.mrb[39].mxu1  ;;  %v1171_v29 = vpop.f32.mrb[39].mxu0  ;;  %v1374_v30 = vadd.f32 %v1343_v38, %v1342_v35  ;;  %v1345_v62 = vmul.f32 %v2530_v55, %v1301_v27 }
 0x1df   :  { %v1168_v61 = vadd.f32 %v1167_v9, %v1055_v41  ;;  %v1059_v31 = vadd.f32 %v1058_v17, %v2517_v53 }
 0x1e0   :  { %vm1238_vm5 = vcmp.gt.f32.partialorder %v1166_v42, 0.0  ;;  %v1270_v32 = vmul.f32 0.2, %v1166_v42  ;;  %v1170_v39 = vadd.f32 %v1169_v26, %v1057_v43  ;;  %1375 = vadd.xlane.f32.xlu0 %v1374_v30  ;;  %v1377_v45 = vadd.f32 %v1345_v62, %v1344_v28 }
 0x1e1   :  { %vm1239_vm6 = vcmp.gt.f32.partialorder %v1168_v61, 0.0  ;;  %v1271_v21 = vmul.f32 0.2, %v1168_v61  ;;  %v1172_v44 = vadd.f32 %v1171_v29, %v1059_v31 }
 0x1e2   :  { %vm1240_vm7 = vcmp.gt.f32.partialorder %v1170_v39, 0.0  ;;  %v1272_v16 = vmul.f32 0.2, %v1170_v39  ;;  %v1302_v46 = vsel %vm1238_vm5, %v1166_v42, %v1270_v32 }
 0x1e3   :  { %vm1241_vm8 = vcmp.gt.f32.partialorder %v1172_v44, 0.0  ;;  %v1273_v15 = vmul.f32 0.2, %v1172_v44  ;;  %v1303_v36 = vsel %vm1239_vm6, %v1168_v61, %v1271_v21  ;;  %v1346_v49 = vmul.f32 %v2527_v18, %v1302_v46  ;;  %v1062_v25 = vpop.f32.mrb[40].mxu1 }
 0x1e4   :  { %1378 = vadd.xlane.f32.xlu0 %v1377_v45  ;;  %v1347_v47 = vmul.f32 %v2530_v55, %v1303_v36  ;;  %v1304_v50 = vsel %vm1240_vm7, %v1170_v39, %v1272_v16  ;;  %v1063_v52 = vadd.f32 %v1062_v25, %v2514_v54  ;;  %v1064_v57 = vpop.f32.mrb[41].mxu1 }
 0x1e5   :  { %v1305_v2 = vsel %vm1241_vm8, %v1172_v44, %v1273_v15  ;;  %v1348_v24 = vmul.f32 %v2527_v18, %v1304_v50  ;;  %v1065_v60 = vadd.f32 %v1064_v57, %v2517_v53  ;;  %v1066_v1 = vpop.f32.mrb[42].mxu1 }
 0x1e6   :  { %v1380_v4 = vadd.f32 %v1347_v47, %v1346_v49  ;;  %v1349_v6 = vmul.f32 %v2530_v55, %v1305_v2  ;;  %v1067_v7 = vadd.f32 %v1066_v1, %v2514_v54  ;;  %v1068_v51 = vpop.f32.mrb[43].mxu1  ;;  %v1175_v63 = vpop.f32.mrb[40].mxu0 }
 0x1e7   :  { %v1069_v37 = vadd.f32 %v1068_v51, %v2517_v53  ;;  %v1176_v10 = vadd.f32 %v1175_v63, %v1063_v52  ;;  %v1177_v11 = vpop.f32.mrb[41].mxu0 }
 0x1e8   :  { %1381 = vadd.xlane.f32.xlu1 %v1380_v4  ;;  %v1383_v58 = vadd.f32 %v1349_v6, %v1348_v24  ;;  %v1178_v12 = vadd.f32 %v1177_v11, %v1065_v60  ;;  %v1179_v5 = vpop.f32.mrb[42].mxu0 }
 0x1e9   :  { %vm1242_vm9 = vcmp.gt.f32.partialorder %v1176_v10, 0.0  ;;  %v1274_v13 = vmul.f32 0.2, %v1176_v10  ;;  %v1180_v8 = vadd.f32 %v1179_v5, %v1067_v7  ;;  %v1181_v48 = vpop.f32.mrb[43].mxu0 }
 0x1ea   :  { %vm1243_vm10 = vcmp.gt.f32.partialorder %v1178_v12, 0.0  ;;  %v1275_v59 = vmul.f32 0.2, %v1178_v12  ;;  %v1182_v14 = vadd.f32 %v1181_v48, %v1069_v37 }
 0x1eb   :  { %vm1244_vm11 = vcmp.gt.f32.partialorder %v1180_v8, 0.0  ;;  %v1276_v56 = vmul.f32 0.2, %v1180_v8  ;;  %v1306_v3 = vsel %vm1242_vm9, %v1176_v10, %v1274_v13 }
 0x1ec   :  { %1384 = vadd.xlane.f32.xlu1 %v1383_v58  ;;  %vm1245_vm12 = vcmp.gt.f32.partialorder %v1182_v14, 0.0  ;;  %v1277_v19 = vmul.f32 0.2, %v1182_v14  ;;  %v1307_v20 = vsel %vm1243_vm10, %v1178_v12, %v1275_v59  ;;  %v1350_v35 = vmul.f32 %v2527_v18, %v1306_v3 }
 0x1ed   :  { %v1351_v22 = vmul.f32 %v2530_v55, %v1307_v20  ;;  %v1308_v23 = vsel %vm1244_vm11, %v1180_v8, %v1276_v56 }
 0x1ee   :  { %v1072_v9 = vpop.f32.mrb[44].mxu1  ;;  %v1309_v40 = vsel %vm1245_vm12, %v1182_v14, %v1277_v19  ;;  %v1352_v41 = vmul.f32 %v2527_v18, %v1308_v23 }
 0x1ef   :  { %v1185_v38 = vpop.f32.mrb[44].mxu0  ;;  %v1073_v0 = vadd.f32 %v1072_v9, %v2514_v54  ;;  %v1074_v26 = vpop.f32.mrb[45].mxu1  ;;  %v1386_v28 = vadd.f32 %v1351_v22, %v1350_v35  ;;  %v1353_v42 = vmul.f32 %v2530_v55, %v1309_v40 }
 0x1f0   :  { %v1187_v27 = vpop.f32.mrb[45].mxu0  ;;  %v1075_v43 = vadd.f32 %v1074_v26, %v2517_v53  ;;  %v1076_v17 = vpop.f32.mrb[46].mxu1 }
 0x1f1   :  { %v1189_v29 = vpop.f32.mrb[46].mxu0  ;;  %v1186_v30 = vadd.f32 %v1185_v38, %v1073_v0  ;;  %v1077_v62 = vadd.f32 %v1076_v17, %v2514_v54  ;;  %v1078_v61 = vpop.f32.mrb[47].mxu1  ;;  %1387 = vadd.xlane.f32.xlu0 %v1386_v28  ;;  %v1389_v32 = vadd.f32 %v1353_v42, %v1352_v41 }
 0x1f2   :  { %v1191_v31 = vpop.f32.mrb[47].mxu0  ;;  %v1188_v39 = vadd.f32 %v1187_v27, %v1075_v43  ;;  %v1079_v45 = vadd.f32 %v1078_v61, %v2517_v53 }
 0x1f3   :  { %vm1246_vm13 = vcmp.gt.f32.partialorder %v1186_v30, 0.0  ;;  %v1278_v21 = vmul.f32 0.2, %v1186_v30  ;;  %v1190_v44 = vadd.f32 %v1189_v29, %v1077_v62  ;;  %1390 = vadd.xlane.f32.xlu1 %v1389_v32 }
 0x1f4   :  { %vm1247_vm14 = vcmp.gt.f32.partialorder %v1188_v39, 0.0  ;;  %v1279_v16 = vmul.f32 0.2, %v1188_v39  ;;  %v1192_v46 = vadd.f32 %v1191_v31, %v1079_v45 }
 0x1f5   :  { %vm1248_vm15 = vcmp.gt.f32.partialorder %v1190_v44, 0.0  ;;  %v1280_v15 = vmul.f32 0.2, %v1190_v44  ;;  %v1310_v36 = vsel %vm1246_vm13, %v1186_v30, %v1278_v21 }
 0x1f6   :  { %vm1249_vm0 = vcmp.gt.f32.partialorder %v1192_v46, 0.0  ;;  %v1281_v49 = vmul.f32 0.2, %v1192_v46  ;;  %v1311_v25 = vsel %vm1247_vm14, %v1188_v39, %v1279_v16  ;;  %v1354_v47 = vmul.f32 %v2527_v18, %v1310_v36 }
 0x1f7   :  { %v1355_v57 = vmul.f32 %v2530_v55, %v1311_v25  ;;  %v1312_v2 = vsel %vm1248_vm15, %v1190_v44, %v1280_v15 }
 0x1f8   :  { %v1082_v50 = vpop.f32.mrb[48].mxu1  ;;  %v1313_v4 = vsel %vm1249_vm0, %v1192_v46, %v1281_v49  ;;  %v1356_v6 = vmul.f32 %v2527_v18, %v1312_v2 }
 0x1f9   :  { %v1195_v52 = vpop.f32.mrb[48].mxu0  ;;  %v1083_v24 = vadd.f32 %v1082_v50, %v2514_v54  ;;  %v1084_v60 = vpop.f32.mrb[49].mxu1  ;;  %v1392_v37 = vadd.f32 %v1355_v57, %v1354_v47  ;;  %v1357_v58 = vmul.f32 %v2530_v55, %v1313_v4 }
 0x1fa   :  { %v1197_v1 = vpop.f32.mrb[49].mxu0  ;;  %v1085_v7 = vadd.f32 %v1084_v60, %v2517_v53  ;;  %v1086_v51 = vpop.f32.mrb[50].mxu1 }
 0x1fb   :  { %v1199_v63 = vpop.f32.mrb[50].mxu0  ;;  %v1196_v10 = vadd.f32 %v1195_v52, %v1083_v24  ;;  %v1087_v11 = vadd.f32 %v1086_v51, %v2514_v54  ;;  %v1088_v12 = vpop.f32.mrb[51].mxu1  ;;  %1393 = vadd.xlane.f32.xlu0 %v1392_v37  ;;  %v1395_v48 = vadd.f32 %v1357_v58, %v1356_v6 }
 0x1fc   :  { %v1201_v5 = vpop.f32.mrb[51].mxu0  ;;  %v1198_v13 = vadd.f32 %v1197_v1, %v1085_v7  ;;  %v1089_v8 = vadd.f32 %v1088_v12, %v2517_v53 }
 0x1fd   :  { %vm1250_vm1 = vcmp.gt.f32.partialorder %v1196_v10, 0.0  ;;  %v1282_v59 = vmul.f32 0.2, %v1196_v10  ;;  %v1200_v14 = vadd.f32 %v1199_v63, %v1087_v11  ;;  %1396 = vadd.xlane.f32.xlu1 %v1395_v48 }
 0x1fe   :  { %vm1251_vm2 = vcmp.gt.f32.partialorder %v1198_v13, 0.0  ;;  %v1283_v56 = vmul.f32 0.2, %v1198_v13  ;;  %v1202_v3 = vadd.f32 %v1201_v5, %v1089_v8 }
 0x1ff   :  { %vm1252_vm3 = vcmp.gt.f32.partialorder %v1200_v14, 0.0  ;;  %v1284_v19 = vmul.f32 0.2, %v1200_v14  ;;  %v1314_v20 = vsel %vm1250_vm1, %v1196_v10, %v1282_v59  ;;  %vm1547_vm1 = vcmask 130112  }
 0x200   :  { %vm1253_vm4 = vcmp.gt.f32.partialorder %v1202_v3, 0.0  ;;  %v1285_v35 = vmul.f32 0.2, %v1202_v3  ;;  %v1315_v22 = vsel %vm1251_vm2, %v1198_v13, %v1283_v56  ;;  %v1358_v23 = vmul.f32 %v2527_v18, %v1314_v20 }
 0x201   :  { %v1359_v40 = vmul.f32 %v2530_v55, %v1315_v22  ;;  %v1316_v41 = vsel %vm1252_vm3, %v1200_v14, %v1284_v19  ;;  %vm1554_vm2 = vcmask 195712   ;;  %vm1561_vm3 = vcmask 261312  }
 0x202   :  { %v1092_v9 = vpop.f32.mrb[52].mxu1  ;;  %v1317_v28 = vsel %vm1253_vm4, %v1202_v3, %v1285_v35  ;;  %v1360_v42 = vmul.f32 %v2527_v18, %v1316_v41  ;;  %vm1568_vm4 = vcmask 326912  }
 0x203   :  { %v1205_v38 = vpop.f32.mrb[52].mxu0  ;;  %v1093_v0 = vadd.f32 %v1092_v9, %v2514_v54  ;;  %v1094_v26 = vpop.f32.mrb[53].mxu1  ;;  %v1398_v30 = vadd.f32 %v1359_v40, %v1358_v23  ;;  %v1361_v62 = vmul.f32 %v2530_v55, %v1317_v28 }
 0x204   :  { %v1207_v27 = vpop.f32.mrb[53].mxu0  ;;  %v1095_v43 = vadd.f32 %v1094_v26, %v2517_v53  ;;  %v1096_v17 = vpop.f32.mrb[54].mxu1 }
 0x205   :  { %v1209_v29 = vpop.f32.mrb[54].mxu0  ;;  %v1206_v61 = vadd.f32 %v1205_v38, %v1093_v0  ;;  %v1097_v31 = vadd.f32 %v1096_v17, %v2514_v54  ;;  %v1098_v32 = vpop.f32.mrb[55].mxu1  ;;  %1399 = vadd.xlane.f32.xlu0 %v1398_v30  ;;  %v1401_v44 = vadd.f32 %v1361_v62, %v1360_v42 }
 0x206   :  { %v1211_v39 = vpop.f32.mrb[55].mxu0  ;;  %v1208_v45 = vadd.f32 %v1207_v27, %v1095_v43  ;;  %v1099_v21 = vadd.f32 %v1098_v32, %v2517_v53 }
 0x207   :  { %vm1254_vm5 = vcmp.gt.f32.partialorder %v1206_v61, 0.0  ;;  %v1286_v16 = vmul.f32 0.2, %v1206_v61  ;;  %v1210_v46 = vadd.f32 %v1209_v29, %v1097_v31  ;;  %1402 = vadd.xlane.f32.xlu1 %v1401_v44 }
 0x208   :  { %vm1255_vm6 = vcmp.gt.f32.partialorder %v1208_v45, 0.0  ;;  %v1287_v15 = vmul.f32 0.2, %v1208_v45  ;;  %v1212_v36 = vadd.f32 %v1211_v39, %v1099_v21 }
 0x209   :  { %vm1256_vm7 = vcmp.gt.f32.partialorder %v1210_v46, 0.0  ;;  %v1288_v49 = vmul.f32 0.2, %v1210_v46  ;;  %v1318_v25 = vsel %vm1254_vm5, %v1206_v61, %v1286_v16  ;;  %vm1575_vm5 = vcmask 392512  }
 0x20a   :  { %vm1257_vm8 = vcmp.gt.f32.partialorder %v1212_v36, 0.0  ;;  %v1289_v47 = vmul.f32 0.2, %v1212_v36  ;;  %v1319_v50 = vsel %vm1255_vm6, %v1208_v45, %v1287_v15  ;;  %v1362_v52 = vmul.f32 %v2527_v18, %v1318_v25 }
 0x20b   :  { %v1102_v57 = vpop.f32.mrb[56].mxu1  ;;  %v1363_v24 = vmul.f32 %v2530_v55, %v1319_v50  ;;  %v1320_v60 = vsel %vm1256_vm7, %v1210_v46, %v1288_v49  ;;  %vm1582_vm6 = vcmask 458112   ;;  %vm1589_vm7 = vcmask 523712  }
 0x20c   :  { %v1215_v2 = vpop.f32.mrb[56].mxu0  ;;  %v1103_v1 = vadd.f32 %v1102_v57, %v2514_v54  ;;  %v1104_v4 = vpop.f32.mrb[57].mxu1  ;;  %v1321_v7 = vsel %vm1257_vm8, %v1212_v36, %v1289_v47  ;;  %v1364_v51 = vmul.f32 %v2527_v18, %v1320_v60  ;;  %vm1596_vm8 = vcmask 589312  }
 0x20d   :  { %v1217_v6 = vpop.f32.mrb[57].mxu0  ;;  %v1105_v63 = vadd.f32 %v1104_v4, %v2517_v53  ;;  %v1106_v37 = vpop.f32.mrb[58].mxu1  ;;  %v1404_v10 = vadd.f32 %v1363_v24, %v1362_v52  ;;  %v1365_v11 = vmul.f32 %v2530_v55, %v1321_v7 }
 0x20e   :  { %v1219_v58 = vpop.f32.mrb[58].mxu0  ;;  %v1216_v12 = vadd.f32 %v1215_v2, %v1103_v1  ;;  %v1107_v5 = vadd.f32 %v1106_v37, %v2514_v54  ;;  %v1108_v13 = vpop.f32.mrb[59].mxu1 }
 0x20f   :  { %v1221_v8 = vpop.f32.mrb[59].mxu0  ;;  %v1218_v48 = vadd.f32 %v1217_v6, %v1105_v63  ;;  %v1109_v59 = vadd.f32 %v1108_v13, %v2517_v53  ;;  %1405 = vadd.xlane.f32.xlu0 %v1404_v10  ;;  %v1407_v14 = vadd.f32 %v1365_v11, %v1364_v51  ;;  %v2595_v63 = vstv %s2670_s6  ;;  %s2045_s6 = smov [#allocation6]  }
 0x210   :  { %vm1258_vm9 = vcmp.gt.f32.partialorder %v1216_v12, 0.0  ;;  %v1290_v56 = vmul.f32 0.2, %v1216_v12  ;;  %v1220_v3 = vadd.f32 %v1219_v58, %v1107_v5  ;;  %s1655_s17 = sshll.u32 %s2045_s6, 4  ;;  %s1656_s17 = int_to_ptr.vmem [resolvable:$true] %s1655_s17 }
 0x211   :  { %vm1259_vm10 = vcmp.gt.f32.partialorder %v1218_v48, 0.0  ;;  %v1291_v19 = vmul.f32 0.2, %v1218_v48  ;;  %v1222_v20 = vadd.f32 %v1221_v8, %v1109_v59  ;;  %1408 = vadd.xlane.f32.xlu1 %v1407_v14  ;;  %s2015_s18 = scalar_lea.vmem %s1656_s17, 16  ;;  %s2019_s19 = scalar_lea.vmem %s1656_s17, 32 }
 0x212   :  { %vm1260_vm11 = vcmp.gt.f32.partialorder %v1220_v3, 0.0  ;;  %v1292_v35 = vmul.f32 0.2, %v1220_v3  ;;  %v1322_v22 = vsel %vm1258_vm9, %v1216_v12, %v1290_v56  ;;  %vm1603_vm9 = vcmask 654912   ;;  %p2016_p8 = scmp.ne.s32.totalorder %s1656_s17, %s2015_s18  ;;  %p2020_p9 = scmp.lt.s32.totalorder %s1656_s17, %s1656_s17 }
 0x213   :  { %vm1261_vm12 = vcmp.gt.f32.partialorder %v1222_v20, 0.0  ;;  %v1293_v23 = vmul.f32 0.2, %v1222_v20  ;;  %v1112_v9 = vpop.f32.mrb[60].mxu1  ;;  %v1323_v40 = vsel %vm1259_vm10, %v1218_v48, %v1291_v19  ;;  %v1366_v41 = vmul.f32 %v2527_v18, %v1322_v22  ;;  %p2021_p10 = scmp.lt.s32.totalorder %s2019_s19, %s2015_s18 }
 0x214   :  { %v1225_v38 = vpop.f32.mrb[60].mxu0  ;;  %v1113_v0 = vadd.f32 %v1112_v9, %v2514_v54  ;;  %v1114_v26 = vpop.f32.mrb[61].mxu1  ;;  %v1367_v28 = vmul.f32 %v2530_v55, %v1323_v40  ;;  %v1324_v42 = vsel %vm1260_vm11, %v1220_v3, %v1292_v35  ;;  %vm1610_vm10 = vcmask 720512  }
 0x215   :  { %v1227_v27 = vpop.f32.mrb[61].mxu0  ;;  %v1115_v43 = vadd.f32 %v1114_v26, %v2517_v53  ;;  %v1116_v17 = vpop.f32.mrb[62].mxu1  ;;  %v1325_v30 = vsel %vm1261_vm12, %v1222_v20, %v1293_v23  ;;  %v1368_v62 = vmul.f32 %v2527_v18, %v1324_v42  ;;  %vm1617_vm11 = vcmask 786112   ;;  %p2022_p11 = por %p2021_p10, %p2020_p9 }
 0x216   :  { %v1229_v29 = vpop.f32.mrb[62].mxu0  ;;  %v1226_v61 = vadd.f32 %v1225_v38, %v1113_v0  ;;  %v1117_v31 = vadd.f32 %v1116_v17, %v2514_v54  ;;  %v1118_v32 = vpop.f32.mrb[63].mxu1  ;;  %v1410_v45 = vadd.f32 %v1367_v28, %v1366_v41  ;;  %v1369_v21 = vmul.f32 %v2530_v55, %v1325_v30 }
 0x217   :  { %v1231_v39 = vpop.f32.mrb[63].mxu0  ;;  %v1228_v44 = vadd.f32 %v1227_v27, %v1115_v43  ;;  %v1119_v16 = vadd.f32 %v1118_v32, %v2517_v53  ;;  %vm1624_vm12 = vcmask 851712   ;;  %p2023_p12 = pnand %p2022_p11, %p2016_p8 }
 0x218   :  { %vm1262_vm13 = vcmp.gt.f32.partialorder %v1226_v61, 0.0  ;;  %v1294_v46 = vmul.f32 0.2, %v1226_v61  ;;  %v1230_v15 = vadd.f32 %v1229_v29, %v1117_v31  ;;  %1411 = vadd.xlane.f32.xlu0 %v1410_v45  ;;  %v1413_v36 = vadd.f32 %v1369_v21, %v1368_v62 }
 0x219   :  { %vm1263_vm14 = vcmp.gt.f32.partialorder %v1228_v44, 0.0  ;;  %v1295_v49 = vmul.f32 0.2, %v1228_v44  ;;  %v1232_v25 = vadd.f32 %v1231_v39, %v1119_v16 }
 0x21a   :  { %vm1264_vm15 = vcmp.gt.f32.partialorder %v1230_v15, 0.0  ;;  %v1296_v47 = vmul.f32 0.2, %v1230_v15  ;;  %1414 = vadd.xlane.f32.xlu1 %v1413_v36  ;;  %v1326_v54 = vsel %vm1262_vm13, %v1226_v61, %v1294_v46  ;;  %vm1631_vm13 = vcmask 917312  }
 0x21b   :  { %vm1265_vm0 = vcmp.gt.f32.partialorder %v1232_v25, 0.0  ;;  %v1297_v50 = vmul.f32 0.2, %v1232_v25  ;;  %v1327_v52 = vsel %vm1263_vm14, %v1228_v44, %v1295_v49  ;;  %v1370_v57 = vmul.f32 %v2527_v18, %v1326_v54 }
 0x21c   :  { %v1371_v2 = vmul.f32 %v2530_v55, %v1327_v52  ;;  %v1328_v53 = vsel %vm1264_vm15, %v1230_v15, %v1296_v47  ;;  %vm1638_vm14 = vcmask 982912   ;;  %vm1645_vm15 = vcmask 1048512  }
 0x21d   :  { %v1329_v24 = vsel %vm1265_vm0, %v1232_v25, %v1297_v50  ;;  %v1372_v60 = vmul.f32 %v2527_v18, %v1328_v53 }
 0x21e   :  { %v1416_v1 = vadd.f32 %v1371_v2, %v1370_v57  ;;  %v1373_v4 = vmul.f32 %v2530_v55, %v1329_v24 }
 0x220   :  { %1417 = vadd.xlane.f32.xlu0 %v1416_v1  ;;  %v1419_v6 = vadd.f32 %v1373_v4, %v1372_v60 }
 0x222   :  { %1420 = vadd.xlane.f32.xlu1 %v1419_v6 }
 0x26d   :  { %v1376_v7 = vpop.xlane.xlu0 %1375 }
 0x26e   :  { %v1424_v58 = vadd.f32 %v2595_v63, %v1376_v7 }
 0x270   :  { %v1440_v55 = vsub.f32 0.0, %v1424_v58 }
 0x271   :  { %v1379_v37 = vpop.xlane.xlu0 %1378 }
 0x272   :  { %v1425_v11 = vadd.f32 %v2595_v63, %v1379_v37  ;;  %v1456_v56 = vmul.f32 1.442695, %v1440_v55 }
 0x274   :  { %v1441_v8 = vsub.f32 0.0, %v1425_v11  ;;  %1929 = vpow2.f32 %v1456_v56 }
 0x275   :  { %v1382_v51 = vpop.xlane.xlu1 %1381 }
 0x276   :  { %v1426_v18 = vadd.f32 %v2595_v63, %v1382_v51  ;;  %v1458_v20 = vmul.f32 1.442695, %v1441_v8 }
 0x278   :  { %v1442_v59 = vsub.f32 0.0, %v1426_v18  ;;  %1931 = vpow2.f32 %v1458_v20  ;;  %v2612_v18 = vand.u32 127, %v77_v33 }
 0x279   :  { %v1385_v10 = vpop.xlane.xlu1 %1384 }
 0x27a   :  { %v1427_v5 = vadd.f32 %v2595_v63, %v1385_v10  ;;  %v1460_v9 = vmul.f32 1.442695, %v1442_v59  ;;  %v1542_v8 = vadd.s32 4294967288, %v2612_v18 }
 0x27c   :  { %v1443_v19 = vsub.f32 0.0, %v1427_v5  ;;  %1933 = vpow2.f32 %v1460_v9 }
 0x27e   :  { %v1388_v12 = vpop.xlane.xlu0 %1387  ;;  %v1462_v40 = vmul.f32 1.442695, %v1443_v19  ;;  %v1930_v32 = vpop.eup %1929  ;;  %v1556_v19 = vadd.s32 4294967272, %v2612_v18 }
 0x27f   :  { %v1428_v48 = vadd.f32 %v2595_v63, %v1388_v12  ;;  %v1488_v36 = vadd.f32 1.0, %v1930_v32 }
 0x280   :  { %v1391_v13 = vpop.xlane.xlu1 %1390  ;;  %1935 = vpow2.f32 %v1462_v40  ;;  %v1545_v40 = vsub.s32 %v1542_v8, %v2203_v34 }
 0x281   :  { %v1429_v3 = vadd.f32 %v2595_v63, %v1391_v13  ;;  %v1444_v35 = vsub.f32 0.0, %v1428_v48  ;;  %v1549_v48 = vadd.s32 4294967280, %v2612_v18 }
 0x282   :  { %v1932_v44 = vpop.eup %1931 }
 0x283   :  { %v1445_v38 = vsub.f32 0.0, %v1429_v3  ;;  %v1464_v26 = vmul.f32 1.442695, %v1444_v35  ;;  %v1489_v54 = vadd.f32 1.0, %v1932_v44  ;;  %v1584_v44 = vadd.s32 4294967240, %v2612_v18 }
 0x285   :  { %v1466_v43 = vmul.f32 1.442695, %v1445_v38  ;;  %1937 = vpow2.f32 %v1464_v26 }
 0x286   :  { %v1934_v15 = vpop.eup %1933 }
 0x287   :  { %1939 = vpow2.f32 %v1466_v43  ;;  %v1490_v2 = vadd.f32 1.0, %v1934_v15 }
 0x288   :  { %v1394_v14 = vpop.xlane.xlu0 %1393 }
 0x289   :  { %v1430_v22 = vadd.f32 %v2595_v63, %v1394_v14 }
 0x28a   :  { %v1397_v23 = vpop.xlane.xlu1 %1396  ;;  %v1936_v47 = vpop.eup %1935 }
 0x28b   :  { %v1431_v41 = vadd.f32 %v2595_v63, %v1397_v23  ;;  %v1446_v27 = vsub.f32 0.0, %v1430_v22  ;;  %v1491_v60 = vadd.f32 1.0, %v1936_v47  ;;  %v1540_v22 = vsub.s32 %v2612_v18, %v2203_v34 }
 0x28c   :  { %v1563_v23 = vadd.s32 4294967264, %v2612_v18 }
 0x28d   :  { %v1447_v29 = vsub.f32 0.0, %v1431_v41  ;;  %v1468_v30 = vmul.f32 1.442695, %v1446_v27  ;;  %v1552_v41 = vsub.s32 %v1549_v48, %v2203_v34 }
 0x28f   :  { %v1470_v31 = vmul.f32 1.442695, %v1447_v29  ;;  %1941 = vpow2.f32 %v1468_v30  ;;  %v1938_v57 = vpop.eup %1937  ;;  %v1570_v29 = vadd.s32 4294967256, %v2612_v18 }
 0x290   :  { %v1492_v1 = vadd.f32 1.0, %v1938_v57 }
 0x291   :  { %1943 = vpow2.f32 %v1470_v31  ;;  %v1940_v24 = vpop.eup %1939  ;;  %v1577_v31 = vadd.s32 4294967248, %v2612_v18 }
 0x292   :  { %v1400_v0 = vpop.xlane.xlu0 %1399  ;;  %v1493_v51 = vadd.f32 1.0, %v1940_v24 }
 0x293   :  { %v1432_v28 = vadd.f32 %v2595_v63, %v1400_v0 }
 0x294   :  { %v1403_v42 = vpop.xlane.xlu1 %1402 }
 0x295   :  { %v1433_v17 = vadd.f32 %v2595_v63, %v1403_v42  ;;  %v1448_v62 = vsub.f32 0.0, %v1432_v28 }
 0x297   :  { %v1449_v61 = vsub.f32 0.0, %v1433_v17  ;;  %v1472_v39 = vmul.f32 1.442695, %v1448_v62  ;;  %v1559_v17 = vsub.s32 %v1556_v19, %v2203_v34 }
 0x299   :  { %v1474_v16 = vmul.f32 1.442695, %v1449_v61  ;;  %1945 = vpow2.f32 %v1472_v39  ;;  %v1942_v6 = vpop.eup %1941  ;;  %v1566_v61 = vsub.s32 %v1563_v23, %v2203_v34 }
 0x29a   :  { %v1494_v12 = vadd.f32 1.0, %v1942_v6 }
 0x29b   :  { %1947 = vpow2.f32 %v1474_v16  ;;  %v1944_v11 = vpop.eup %1943 }
 0x29c   :  { %v1406_v45 = vpop.xlane.xlu0 %1405  ;;  %1949 = vrcp.f32 %v1488_v36  ;;  %v1495_v14 = vadd.f32 1.0, %v1944_v11 }
 0x29d   :  { %v1434_v21 = vadd.f32 %v2595_v63, %v1406_v45 }
 0x29e   :  { %v1409_v46 = vpop.xlane.xlu1 %1408 }
 0x29f   :  { %v1450_v49 = vsub.f32 0.0, %v1434_v21  ;;  %v1435_v25 = vadd.f32 %v2595_v63, %v1409_v46 }
 0x2a1   :  { %v1476_v50 = vmul.f32 1.442695, %v1450_v49  ;;  %v1451_v52 = vsub.f32 0.0, %v1435_v25  ;;  %v1573_v25 = vsub.s32 %v1570_v29, %v2203_v34 }
 0x2a3   :  { %v1478_v53 = vmul.f32 1.442695, %v1451_v52  ;;  %1951 = vpow2.f32 %v1476_v50  ;;  %v1946_v55 = vpop.eup %1945  ;;  %v1580_v50 = vsub.s32 %v1577_v31, %v2203_v34  ;;  %v1591_v52 = vadd.s32 4294967232, %v2612_v18 }
 0x2a4   :  { %1953 = vrcp.f32 %v1489_v54  ;;  %v1496_v33 = vadd.f32 1.0, %v1946_v55 }
 0x2a5   :  { %v1412_v4 = vpop.xlane.xlu0 %1411  ;;  %1955 = vrcp.f32 %v1490_v2  ;;  %v1948_v59 = vpop.eup %1947  ;;  %v1594_v11 = vsub.s32 %v1591_v52, %v2203_v34 }
 0x2a6   :  { %v1436_v7 = vadd.f32 %v2595_v63, %v1412_v4  ;;  %1957 = vpow2.f32 %v1478_v53  ;;  %v1950_v3 = vpop.eup %1949  ;;  %v1497_v0 = vadd.f32 1.0, %v1948_v59  ;;  %v1598_v4 = vadd.s32 4294967224, %v2612_v18 }
 0x2a7   :  { %v1415_v37 = vpop.xlane.xlu1 %1414  ;;  %1959 = vrcp.f32 %v1491_v60  ;;  %v1541_v36 = vrot.slane %v1950_v3, %v1540_v22 }
 0x2a8   :  { %v1452_v58 = vsub.f32 0.0, %v1436_v7  ;;  %v1437_v10 = vadd.f32 %v2595_v63, %v1415_v37  ;;  %1961 = vrcp.f32 %v1492_v1  ;;  %v1587_v1 = vsub.s32 %v1584_v44, %v2203_v34 }
 0x2a9   :  { %1963 = vrcp.f32 %v1493_v51  ;;  %v1601_v59 = vsub.s32 %v1598_v4, %v2203_v34 }
 0x2aa   :  { %v1480_v5 = vmul.f32 1.442695, %v1452_v58  ;;  %v1453_v13 = vsub.f32 0.0, %v1437_v10 }
 0x2ac   :  { %1965 = vpow2.f32 %v1480_v5  ;;  %v1482_v56 = vmul.f32 1.442695, %v1453_v13  ;;  %v1612_v5 = vadd.s32 4294967208, %v2612_v18 }
 0x2ad   :  { %1967 = vrcp.f32 %v1494_v12  ;;  %v1418_v20 = vpop.xlane.xlu0 %1417  ;;  %v1952_v35 = vpop.eup %1951  ;;  %v1605_v12 = vadd.s32 4294967216, %v2612_v18 }
 0x2ae   :  { %1969 = vpow2.f32 %v1482_v56  ;;  %v1438_v9 = vadd.f32 %v2595_v63, %v1418_v20  ;;  %v1954_v38 = vpop.eup %1953  ;;  %v1498_v30 = vadd.f32 1.0, %v1952_v35  ;;  %v1615_v23 = vsub.s32 %v1612_v5, %v2203_v34 }
 0x2af   :  { %v1421_v26 = vpop.xlane.xlu1 %1420  ;;  %v1956_v27 = vpop.eup %1955  ;;  %1971 = vrcp.f32 %v1495_v14  ;;  %v1546_v21 = vrot.slane %v1954_v38, %v1545_v40  ;;  %v1608_v19 = vsub.s32 %v1605_v12, %v2203_v34 }
 0x2b0   :  { %v1454_v28 = vsub.f32 0.0, %v1438_v9  ;;  %v1439_v42 = vadd.f32 %v2595_v63, %v1421_v26  ;;  %v1958_v43 = vpop.eup %1957  ;;  %1973 = vrcp.f32 %v1496_v33  ;;  %v1553_v63 = vrot.slane %v1956_v27, %v1552_v41 }
 0x2b1   :  { %v1960_v62 = vpop.eup %1959  ;;  %1975 = vrcp.f32 %v1497_v0  ;;  %v1499_v16 = vadd.f32 1.0, %v1958_v43  ;;  %v1548_v2 = vsel %vm1547_vm1, %v1546_v21, %v1541_v36  ;;  %v1619_v33 = vadd.s32 4294967200, %v2612_v18 }
 0x2b2   :  { %v1484_v32 = vmul.f32 1.442695, %v1454_v28  ;;  %v1455_v39 = vsub.f32 0.0, %v1439_v42  ;;  %v1962_v45 = vpop.eup %1961  ;;  %v1560_v49 = vrot.slane %v1960_v62, %v1559_v17  ;;  %v1555_v60 = vsel %vm1554_vm2, %v1553_v63, %v1548_v2 }
 0x2b3   :  { %v1964_v15 = vpop.eup %1963  ;;  %v1567_v54 = vrot.slane %v1962_v45, %v1566_v61  ;;  %v1626_v9 = vadd.s32 4294967192, %v2612_v18  ;;  %v1622_v28 = vsub.s32 %v1619_v33, %v2203_v34  ;;  %v1633_v43 = vadd.s32 4294967184, %v2612_v18 }
 0x2b4   :  { %1977 = vpow2.f32 %v1484_v32  ;;  %v1486_v46 = vmul.f32 1.442695, %v1455_v39  ;;  %v1562_v6 = vsel %vm1561_vm3, %v1560_v49, %v1555_v60  ;;  %v1574_v7 = vrot.slane %v1964_v15, %v1573_v25 }
 0x2b5   :  { %1979 = vrcp.f32 %v1498_v30  ;;  %v1569_v58 = vsel %vm1568_vm4, %v1567_v54, %v1562_v6  ;;  %v1629_v30 = vsub.s32 %v1626_v9, %v2203_v34  ;;  %v1640_v32 = vadd.s32 4294967176, %v2612_v18 }
 0x2b6   :  { %v1966_v47 = vpop.eup %1965  ;;  %1981 = vpow2.f32 %v1486_v46  ;;  %v1576_v8 = vsel %vm1575_vm5, %v1574_v7, %v1569_v58  ;;  %v1636_v39 = vsub.s32 %v1633_v43, %v2203_v34 }
 0x2b7   :  { %v1968_v57 = vpop.eup %1967  ;;  %v1500_v53 = vadd.f32 1.0, %v1966_v47  ;;  %1983 = vrcp.f32 %v1499_v16  ;;  %v1643_v63 = vsub.s32 %v1640_v32, %v2203_v34 }
 0x2b8   :  { %v1970_v24 = vpop.eup %1969  ;;  %v1581_v10 = vrot.slane %v1968_v57, %v1580_v50 }
 0x2b9   :  { %1985 = vrcp.f32 %v1500_v53  ;;  %v1501_v51 = vadd.f32 1.0, %v1970_v24  ;;  %v1972_v37 = vpop.eup %1971 }
 0x2ba   :  { %v1974_v55 = vpop.eup %1973  ;;  %v1588_v48 = vrot.slane %v1972_v37, %v1587_v1  ;;  %v1583_v56 = vsel %vm1582_vm6, %v1581_v10, %v1576_v8 }
 0x2bb   :  { %1987 = vrcp.f32 %v1501_v51  ;;  %v1976_v13 = vpop.eup %1975  ;;  %v1595_v3 = vrot.slane %v1974_v55, %v1594_v11 }
 0x2bc   :  { %v1602_v38 = vrot.slane %v1976_v13, %v1601_v59  ;;  %v1590_v41 = vsel %vm1589_vm7, %v1588_v48, %v1583_v56 }
 0x2bd   :  { %v1597_v27 = vsel %vm1596_vm8, %v1595_v3, %v1590_v41 }
 0x2be   :  { %v1978_v14 = vpop.eup %1977  ;;  %v1604_v17 = vsel %vm1603_vm9, %v1602_v38, %v1597_v27 }
 0x2bf   :  { %v1980_v20 = vpop.eup %1979  ;;  %v1502_v35 = vadd.f32 1.0, %v1978_v14 }
 0x2c0   :  { %v1982_v22 = vpop.eup %1981  ;;  %v1609_v26 = vrot.slane %v1980_v20, %v1608_v19 }
 0x2c1   :  { %1989 = vrcp.f32 %v1502_v35  ;;  %v1503_v40 = vadd.f32 1.0, %v1982_v22  ;;  %v1984_v0 = vpop.eup %1983 }
 0x2c2   :  { %v1616_v29 = vrot.slane %v1984_v0, %v1615_v23  ;;  %v1611_v61 = vsel %vm1610_vm10, %v1609_v26, %v1604_v17 }
 0x2c3   :  { %v1986_v42 = vpop.eup %1985  ;;  %1991 = vrcp.f32 %v1503_v40 }
 0x2c4   :  { %v1623_v31 = vrot.slane %v1986_v42, %v1622_v28  ;;  %v1618_v45 = vsel %vm1617_vm11, %v1616_v29, %v1611_v61 }
 0x2c5   :  { %v1988_v62 = vpop.eup %1987 }
 0x2c6   :  { %v1630_v21 = vrot.slane %v1988_v62, %v1629_v30  ;;  %v1625_v44 = vsel %vm1624_vm12, %v1623_v31, %v1618_v45 }
 0x2c8   :  { %v1632_v36 = vsel %vm1631_vm13, %v1630_v21, %v1625_v44 }
 0x2cb   :  { %v1990_v16 = vpop.eup %1989 }
 0x2cc   :  { %v1637_v46 = vrot.slane %v1990_v16, %v1636_v39 }
 0x2cd   :  { %v1992_v15 = vpop.eup %1991 }
 0x2ce   :  { %v1639_v49 = vsel %vm1638_vm14, %v1637_v46, %v1632_v36  ;;  %v1644_v25 = vrot.slane %v1992_v15, %v1643_v63 }
 0x2d0   :  { %v1646_v18 = vsel %vm1645_vm15, %v1644_v25, %v1639_v49 }
 0x2d1   :  { %1648 = vst [vmem:[#allocation6] sm:$0x1] %v1646_v18 }
 0x2d2   :  { %2026 = shalt.err (!%p2023_p12)
}
 0x2d3   :  { %s2027_s21 = scalar_lea.hbm %s2671_s7, 16 }
 0x2d4   :  { %p2028_p13 = scmp.ne.s32.totalorder %s2671_s7, %s2027_s21  ;;  %p2031_p0 = scmp.lt.u32.totalorder %s2027_s21, %s2671_s7 }
 0x2d6   :  { %p2033_p1 = pnand %p2031_p0, %p2028_p13 }
 0x2d8   :  { %2036 = shalt.err (!%p2033_p1)
}
 0x2d9   :  { %1658 = dma.vmem_to_hbm [thread:$0]  %s1656_s17, 16, %s2671_s7, [#allocation5]  }
 0x2da   :  { %2039 = dma.done.wait [#allocation5], 16  }
 0x2db   :  { %2040 = vsyncadd [#allocation5], 4294967280 }
 0x2dc   :  { %1662 = vsyncpa [#allocation4], 1 }
 0x2dd   :  { %1663 = vsyncpa [#allocation5], 1 }

</bundles_post_ra>
